<compile_context>
chip_gen: v6e
topology: v6e:2x2x1
jax: 0.10.0
libtpu: 0.0.40
codegen_flags: <defaults>
</compile_context>

<pallas_src>
import functools
import math

import jax
import jax.numpy as jnp
from jax import lax
from jax.experimental import pallas as pl
from jax.experimental.pallas import tpu as pltpu

F32 = jnp.float32
BF16 = jnp.bfloat16

# --------------------------- configuration (toy CLIP text tower) -------------
VOCAB = 64
N_CLS = 4          # number of prompt rows
LT = 16            # context length  (N_CLS*LT = 64, multiple of 8)
DT = 32            # transformer width
HT = 2             # attention heads
NLAYERS = 2        # transformer depth
MLP = 4 * DT       # 128 -> lane-dense MLP hidden
EMBED = 32         # output embedding dim
CLS_BLK = 2        # prompt rows per grid step (2 steps -> 2 TCs on v7x)


# ------------------------------ in-kernel math --------------------------------
def _ln(x, g, b, eps=1e-5):
    mu = jnp.mean(x, axis=-1, keepdims=True)
    var = jnp.mean((x - mu) ** 2, axis=-1, keepdims=True)
    return (x - mu) * lax.rsqrt(var + eps) * g + b


def _softmax(x):
    m = jnp.max(x, axis=-1, keepdims=True)
    e = jnp.exp(x - m)
    return e * pl.reciprocal(jnp.sum(e, axis=-1, keepdims=True), approx=True)


def _mm(a, b):
    # bf16 MXU matmul with f32 accumulation.
    return jnp.dot(a.astype(BF16), b.astype(BF16), preferred_element_type=F32)


# --------------------------------- kernel -------------------------------------
def text_encoder_kernel(prompts_ref, onehot_ref, pos_ref,
                        ln1_g_ref, ln1_b_ref, wqkv_ref, bqkv_ref,
                        wo_ref, bo_ref, ln2_g_ref, ln2_b_ref,
                        w1_ref, b1_ref, w2_ref, b2_ref,
                        lnf_g_ref, lnf_b_ref, proj_ref,
                        o_ref, *, n_heads, n_layers):
    # prompts: (n, l, d) block of prompt rows; x stays resident in VMEM/vregs.
    x = prompts_ref[...] + pos_ref[...][None]
    n, l, d = x.shape
    dh = d // n_heads
    scale = 1.0 / math.sqrt(dh)

    # Causal mask generated in-kernel (no HBM->VMEM mask transfer per block).
    row = lax.broadcasted_iota(jnp.int32, (l, l), 0)
    col = lax.broadcasted_iota(jnp.int32, (l, l), 1)
    neg = jnp.where(col <= row, 0.0, -1e9).astype(F32)        # (l, l) additive

    for li in range(n_layers):                                # static unroll
        # ---------------- multi-head self-attention ----------------
        h = _ln(x, ln1_g_ref[li], ln1_b_ref[li]).reshape(n * l, d)
        qkv = _mm(h, wqkv_ref[li]) + bqkv_ref[li]             # fused QKV matmul
        wo_l = wo_ref[li]

        attn = jnp.zeros((n * l, d), F32)
        for hi in range(n_heads):                             # 2-way static unroll
            qh = qkv[:, 0 * d + hi * dh: 0 * d + (hi + 1) * dh].reshape(n, l, dh)
            kh = qkv[:, 1 * d + hi * dh: 1 * d + (hi + 1) * dh].reshape(n, l, dh)
            vh = qkv[:, 2 * d + hi * dh: 2 * d + (hi + 1) * dh].reshape(n, l, dh)
            att = jnp.einsum('bqd,bkd->bqk', qh.astype(BF16), kh.astype(BF16),
                             preferred_element_type=F32) * scale
            att = _softmax(att + neg[None])
            ctxh = jnp.einsum('bqk,bkd->bqd', att.astype(BF16), vh.astype(BF16),
                              preferred_element_type=F32).reshape(n * l, dh)
            # combine heads via row-slices of the output projection
            # (equivalent to concat(heads) @ wo, without a cross-lane concat)
            attn = attn + _mm(ctxh, wo_l[hi * dh:(hi + 1) * dh, :])
        x = x + (attn + bo_ref[li]).reshape(n, l, d)

        # ---------------- MLP with QuickGELU ----------------
        h = _ln(x, ln2_g_ref[li], ln2_b_ref[li]).reshape(n * l, d)
        h = _mm(h, w1_ref[li]) + b1_ref[li]                   # (n*l, 128)
        h = h * jax.nn.sigmoid(1.702 * h)                     # QuickGELU
        h = _mm(h, w2_ref[li]) + b2_ref[li]
        x = x + h.reshape(n, l, d)

    # ---------------- ln_final + EOT gather + projection ----------------
    h = _ln(x, lnf_g_ref[...], lnf_b_ref[...])                # (n, l, d)
    sel = onehot_ref[...]                                     # (n, l, 1) EOT one-hot
    eot_feat = jnp.sum(h * sel, axis=1)                       # (n, d) gather via mask-sum
    o_ref[...] = _mm(eot_feat, proj_ref[...]).reshape(n, 1, -1)


# ------------------------------ parameters ------------------------------------
def init_params(key):
    ks = jax.random.split(key, 8)
    nrm = lambda k, s: (0.02 * jax.random.normal(k, s)).astype(F32)
    stk = lambda k, s: (0.02 * jax.random.normal(k, (NLAYERS,) + s)).astype(F32)
    return dict(
        pos=nrm(ks[0], (LT, DT)),
        ln1_g=jnp.ones((NLAYERS, 1, DT), F32), ln1_b=jnp.zeros((NLAYERS, 1, DT), F32),
        wqkv=stk(ks[1], (DT, 3 * DT)), bqkv=jnp.zeros((NLAYERS, 1, 3 * DT), F32),
        wo=stk(ks[2], (DT, DT)), bo=jnp.zeros((NLAYERS, 1, DT), F32),
        ln2_g=jnp.ones((NLAYERS, 1, DT), F32), ln2_b=jnp.zeros((NLAYERS, 1, DT), F32),
        w1=stk(ks[3], (DT, MLP)), b1=jnp.zeros((NLAYERS, 1, MLP), F32),
        w2=stk(ks[4], (MLP, DT)), b2=jnp.zeros((NLAYERS, 1, DT), F32),
        lnf_g=jnp.ones((1, DT), F32), lnf_b=jnp.zeros((1, DT), F32),
        text_proj=nrm(ks[5], (DT, EMBED)),
        token_emb=nrm(ks[6], (VOCAB, DT)),
    )


# ------------------------------ forward (wrapper) ------------------------------
def text_encoder_forward(params, prompts, tokenized_prompts):
    n_cls, lt, dt = prompts.shape

    # Glue: EOT position per row (largest token id == EOT, as in reference CLIP).
    # TODO(synk): real CLIP BPE tokenization has no Pallas/JAX equivalent; token
    # ids are synthesized so argmax(dim=-1) picks the EOT token.
    eot = jnp.argmax(tokenized_prompts, axis=-1)
    onehot = jax.nn.one_hot(eot, lt, dtype=F32).reshape(n_cls, lt, 1)

    weights = (params['pos'],
               params['ln1_g'], params['ln1_b'], params['wqkv'], params['bqkv'],
               params['wo'], params['bo'], params['ln2_g'], params['ln2_b'],
               params['w1'], params['b1'], params['w2'], params['b2'],
               params['lnf_g'], params['lnf_b'], params['text_proj'])

    def rep(a):   # full-array block, resident across the (parallel) class axis
        return pl.BlockSpec(a.shape, lambda *_, nd=a.ndim: (0,) * nd)

    out = pl.pallas_call(
        functools.partial(text_encoder_kernel, n_heads=HT, n_layers=NLAYERS),
        out_shape=jax.ShapeDtypeStruct((n_cls, 1, EMBED), F32),
        grid=(n_cls // CLS_BLK,),
        in_specs=[pl.BlockSpec((CLS_BLK, lt, dt), lambda i: (i, 0, 0)),   # prompts
                  pl.BlockSpec((CLS_BLK, lt, 1), lambda i: (i, 0, 0)),    # EOT one-hot
                  ] + [rep(w) for w in weights],
        out_specs=pl.BlockSpec((CLS_BLK, 1, EMBED), lambda i: (i, 0, 0)),
        compiler_params=pltpu.CompilerParams(
            dimension_semantics=("parallel",)),     # 2 TCs on v7x; serial elsewhere
    )(prompts, onehot, *weights)
    return out.reshape(n_cls, EMBED)


# ------------------------------ pure-JAX reference -----------------------------
def text_encoder_ref(params, prompts, tokenized_prompts):
    x = prompts + params['pos'][None]
    n, l, d = x.shape
    dh = d // HT

    def ln(v, g, b, eps=1e-5):
        mu = v.mean(-1, keepdims=True)
        var = ((v - mu) ** 2).mean(-1, keepdims=True)
        return (v - mu) / jnp.sqrt(var + eps) * g + b

    r = jnp.arange(l)[:, None]
    c = jnp.arange(l)[None, :]
    mask = jnp.where(c <= r, 0.0, -1e9).astype(F32)
    for li in range(NLAYERS):
        h = ln(x, params['ln1_g'][li], params['ln1_b'][li]).reshape(n * l, d)
        qkv = h @ params['wqkv'][li] + params['bqkv'][li]
        q, k, v = [qkv[:, i * d:(i + 1) * d].reshape(n, l, HT, dh) for i in range(3)]
        att = jnp.einsum('blhe,bmhe->bhlm', q, k) / math.sqrt(dh) + mask
        att = jax.nn.softmax(att, axis=-1)
        ctx = jnp.einsum('bhlm,bmhe->blhe', att, v).reshape(n * l, d)
        x = x + (ctx @ params['wo'][li] + params['bo'][li]).reshape(n, l, d)
        h = ln(x, params['ln2_g'][li], params['ln2_b'][li]).reshape(n * l, d)
        h = h @ params['w1'][li] + params['b1'][li]
        h = h * jax.nn.sigmoid(1.702 * h)
        x = x + (h @ params['w2'][li] + params['b2'][li]).reshape(n, l, d)
    x = ln(x, params['lnf_g'], params['lnf_b'])
    eot = jnp.argmax(tokenized_prompts, axis=-1)
    return x[jnp.arange(n), eot] @ params['text_proj']


# ----------------------------------- main --------------------------------------
if __name__ == "__main__":
    key = jax.random.PRNGKey(0)
    k_params, _ = jax.random.split(key)
    params = init_params(k_params)

    # synthetic tokenized prompts: [SOT, ctx*4, class_i, '.', EOT, pad...]
    n_ctx = 4
    tok = []
    for i in range(N_CLS):
        tok.append([2] + [3] * n_ctx + [10 + i, 5, VOCAB - 1]
                   + [0] * (LT - n_ctx - 4))
    tokenized_prompts = jnp.array(tok, jnp.int32)              # (N_CLS, LT)
    prompts = params['token_emb'][tokenized_prompts]           # (N_CLS, LT, DT)

    fwd = jax.jit(text_encoder_forward)
    out = jax.block_until_ready(fwd(params, prompts, tokenized_prompts))

    assert out.shape == (N_CLS, EMBED), out.shape
    assert bool(jnp.all(jnp.isfinite(out)))

    ref = text_encoder_ref(params, prompts, tokenized_prompts)
    assert bool(jnp.allclose(out, ref, atol=3e-2, rtol=3e-2)), \
        float(jnp.max(jnp.abs(out - ref)))

    print("KERNEL_OK")
</pallas_src>

<mosaic_0001>
module attributes {stable_mosaic.version = 11 : i64} {
  func.func @text_encoder_kernel(%arg0: i32, %arg1: memref<2x16x32xf32, #tpu.memory_space<vmem>>, %arg2: memref<2x16x1xf32, #tpu.memory_space<vmem>>, %arg3: memref<16x32xf32, #tpu.memory_space<vmem>>, %arg4: memref<2x1x32xf32, #tpu.memory_space<vmem>>, %arg5: memref<2x1x32xf32, #tpu.memory_space<vmem>>, %arg6: memref<2x32x96xf32, #tpu.memory_space<vmem>>, %arg7: memref<2x1x96xf32, #tpu.memory_space<vmem>>, %arg8: memref<2x32x32xf32, #tpu.memory_space<vmem>>, %arg9: memref<2x1x32xf32, #tpu.memory_space<vmem>>, %arg10: memref<2x1x32xf32, #tpu.memory_space<vmem>>, %arg11: memref<2x1x32xf32, #tpu.memory_space<vmem>>, %arg12: memref<2x32x128xf32, #tpu.memory_space<vmem>>, %arg13: memref<2x1x128xf32, #tpu.memory_space<vmem>>, %arg14: memref<2x128x32xf32, #tpu.memory_space<vmem>>, %arg15: memref<2x1x32xf32, #tpu.memory_space<vmem>>, %arg16: memref<1x32xf32, #tpu.memory_space<vmem>>, %arg17: memref<1x32xf32, #tpu.memory_space<vmem>>, %arg18: memref<32x32xf32, #tpu.memory_space<vmem>>, %arg19: memref<2x1x32xf32, #tpu.memory_space<vmem>>) attributes {dimension_semantics = [#tpu.dimension_semantics<parallel>], iteration_bounds = array<i64: 2>, scalar_prefetch = 0 : i64, scratch_operands = 0 : i64, tpu.core_type = #tpu.core_type<tc>, window_params = [{transform_indices = @transform_0, window_bounds = array<i64: 2, 16, 32>}, {transform_indices = @transform_1, window_bounds = array<i64: 2, 16, 1>}, {pipeline_mode = #tpu.pipeline_mode<synchronous>, transform_indices = @transform_2, window_bounds = array<i64: 16, 32>}, {pipeline_mode = #tpu.pipeline_mode<synchronous>, transform_indices = @transform_3, window_bounds = array<i64: 2, 1, 32>}, {pipeline_mode = #tpu.pipeline_mode<synchronous>, transform_indices = @transform_4, window_bounds = array<i64: 2, 1, 32>}, {pipeline_mode = #tpu.pipeline_mode<synchronous>, transform_indices = @transform_5, window_bounds = array<i64: 2, 32, 96>}, {pipeline_mode = #tpu.pipeline_mode<synchronous>, transform_indices = @transform_6, window_bounds = array<i64: 2, 1, 96>}, {pipeline_mode = #tpu.pipeline_mode<synchronous>, transform_indices = @transform_7, window_bounds = array<i64: 2, 32, 32>}, {pipeline_mode = #tpu.pipeline_mode<synchronous>, transform_indices = @transform_8, window_bounds = array<i64: 2, 1, 32>}, {pipeline_mode = #tpu.pipeline_mode<synchronous>, transform_indices = @transform_9, window_bounds = array<i64: 2, 1, 32>}, {pipeline_mode = #tpu.pipeline_mode<synchronous>, transform_indices = @transform_10, window_bounds = array<i64: 2, 1, 32>}, {pipeline_mode = #tpu.pipeline_mode<synchronous>, transform_indices = @transform_11, window_bounds = array<i64: 2, 32, 128>}, {pipeline_mode = #tpu.pipeline_mode<synchronous>, transform_indices = @transform_12, window_bounds = array<i64: 2, 1, 128>}, {pipeline_mode = #tpu.pipeline_mode<synchronous>, transform_indices = @transform_13, window_bounds = array<i64: 2, 128, 32>}, {pipeline_mode = #tpu.pipeline_mode<synchronous>, transform_indices = @transform_14, window_bounds = array<i64: 2, 1, 32>}, {pipeline_mode = #tpu.pipeline_mode<synchronous>, transform_indices = @transform_15, window_bounds = array<i64: 1, 32>}, {pipeline_mode = #tpu.pipeline_mode<synchronous>, transform_indices = @transform_16, window_bounds = array<i64: 1, 32>}, {pipeline_mode = #tpu.pipeline_mode<synchronous>, transform_indices = @transform_17, window_bounds = array<i64: 32, 32>}, {transform_indices = @transform_18, window_bounds = array<i64: 2, 1, 32>}]} {
    %c0 = arith.constant 0 : index
    %c0_0 = arith.constant 0 : index
    %c0_1 = arith.constant 0 : index
    %0 = vector.load %arg1[%c0, %c0_0, %c0_1] : memref<2x16x32xf32, #tpu.memory_space<vmem>>, vector<2x16x32xf32>
    %c0_2 = arith.constant 0 : index
    %c0_3 = arith.constant 0 : index
    %1 = vector.load %arg3[%c0_2, %c0_3] : memref<16x32xf32, #tpu.memory_space<vmem>>, vector<16x32xf32>
    %2 = vector.shape_cast %1 : vector<16x32xf32> to vector<1x16x32xf32>
    %3 = vector.broadcast %2 : vector<1x16x32xf32> to vector<2x16x32xf32>
    %4 = arith.addf %0, %3 : vector<2x16x32xf32>
    %5 = tpu.iota {dimensions = array<i32: 0>} : vector<16x16xi32>
    %6 = tpu.iota {dimensions = array<i32: 1>} : vector<16x16xi32>
    %7 = arith.cmpi sle, %6, %5 : vector<16x16xi32>
    %cst = arith.constant 0.000000e+00 : f32
    %cst_4 = arith.constant -1.000000e+09 : f32
    %8 = vector.broadcast %cst : f32 to vector<16x16xf32>
    %9 = vector.broadcast %cst_4 : f32 to vector<16x16xf32>
    %10 = arith.select %7, %8, %9 : vector<16x16xi1>, vector<16x16xf32>
    %c0_5 = arith.constant 0 : index
    %c0_6 = arith.constant 0 : index
    %c0_7 = arith.constant 0 : index
    %11 = vector.load %arg4[%c0_5, %c0_6, %c0_7] : memref<2x1x32xf32, #tpu.memory_space<vmem>>, vector<1x1x32xf32>
    %12 = vector.shape_cast %11 : vector<1x1x32xf32> to vector<1x32xf32>
    %c0_8 = arith.constant 0 : index
    %c0_9 = arith.constant 0 : index
    %c0_10 = arith.constant 0 : index
    %13 = vector.load %arg5[%c0_8, %c0_9, %c0_10] : memref<2x1x32xf32, #tpu.memory_space<vmem>>, vector<1x1x32xf32>
    %14 = vector.shape_cast %13 : vector<1x1x32xf32> to vector<1x32xf32>
    %cst_11 = arith.constant dense<0.000000e+00> : vector<2x16xf32>
    %15 = vector.multi_reduction <add>, %4, %cst_11 [2] : vector<2x16x32xf32> to vector<2x16xf32>
    %16 = vector.shape_cast %15 : vector<2x16xf32> to vector<2x16x1xf32>
    %cst_12 = arith.constant 3.200000e+01 : f32
    %17 = vector.broadcast %cst_12 : f32 to vector<2x16x1xf32>
    %18 = arith.divf %16, %17 : vector<2x16x1xf32>
    %19 = vector.broadcast %18 : vector<2x16x1xf32> to vector<2x16x32xf32>
    %20 = arith.subf %4, %19 : vector<2x16x32xf32>
    %21 = arith.mulf %20, %20 : vector<2x16x32xf32>
    %cst_13 = arith.constant dense<0.000000e+00> : vector<2x16xf32>
    %22 = vector.multi_reduction <add>, %21, %cst_13 [2] : vector<2x16x32xf32> to vector<2x16xf32>
    %23 = vector.shape_cast %22 : vector<2x16xf32> to vector<2x16x1xf32>
    %cst_14 = arith.constant 3.200000e+01 : f32
    %24 = vector.broadcast %cst_14 : f32 to vector<2x16x1xf32>
    %25 = arith.divf %23, %24 : vector<2x16x1xf32>
    %26 = vector.broadcast %18 : vector<2x16x1xf32> to vector<2x16x32xf32>
    %27 = arith.subf %4, %26 : vector<2x16x32xf32>
    %cst_15 = arith.constant 9.99999974E-6 : f32
    %28 = vector.broadcast %cst_15 : f32 to vector<2x16x1xf32>
    %29 = arith.addf %25, %28 : vector<2x16x1xf32>
    %30 = math.rsqrt %29 : vector<2x16x1xf32>
    %31 = vector.broadcast %30 : vector<2x16x1xf32> to vector<2x16x32xf32>
    %32 = arith.mulf %27, %31 : vector<2x16x32xf32>
    %33 = vector.shape_cast %12 : vector<1x32xf32> to vector<1x1x32xf32>
    %34 = vector.broadcast %33 : vector<1x1x32xf32> to vector<2x16x32xf32>
    %35 = arith.mulf %32, %34 : vector<2x16x32xf32>
    %36 = vector.shape_cast %14 : vector<1x32xf32> to vector<1x1x32xf32>
    %37 = vector.broadcast %36 : vector<1x1x32xf32> to vector<2x16x32xf32>
    %38 = arith.addf %35, %37 : vector<2x16x32xf32>
    %39 = vector.shape_cast %38 : vector<2x16x32xf32> to vector<32x32xf32>
    %c0_16 = arith.constant 0 : index
    %c0_17 = arith.constant 0 : index
    %c0_18 = arith.constant 0 : index
    %40 = vector.load %arg6[%c0_16, %c0_17, %c0_18] : memref<2x32x96xf32, #tpu.memory_space<vmem>>, vector<1x32x96xf32>
    %41 = vector.shape_cast %40 : vector<1x32x96xf32> to vector<32x96xf32>
    %42 = arith.truncf %39 : vector<32x32xf32> to vector<32x32xbf16>
    %43 = arith.truncf %41 : vector<32x96xf32> to vector<32x96xbf16>
    %cst_19 = arith.constant dense<0.000000e+00> : vector<32x96xf32>
    %44 = tpu.matmul %42, %43, %cst_19 {dimension_numbers = #tpu.dot_dimension_numbers<[1], [0], [0], [1], [0, 0, 1, 1], [], []>} : vector<32x32xbf16>, vector<32x96xbf16>, vector<32x96xf32> -> vector<32x96xf32>
    %c0_20 = arith.constant 0 : index
    %c0_21 = arith.constant 0 : index
    %c0_22 = arith.constant 0 : index
    %45 = vector.load %arg7[%c0_20, %c0_21, %c0_22] : memref<2x1x96xf32, #tpu.memory_space<vmem>>, vector<1x1x96xf32>
    %46 = vector.shape_cast %45 : vector<1x1x96xf32> to vector<1x96xf32>
    %47 = vector.broadcast %46 : vector<1x96xf32> to vector<32x96xf32>
    %48 = arith.addf %44, %47 : vector<32x96xf32>
    %c0_23 = arith.constant 0 : index
    %c0_24 = arith.constant 0 : index
    %c0_25 = arith.constant 0 : index
    %49 = vector.load %arg8[%c0_23, %c0_24, %c0_25] : memref<2x32x32xf32, #tpu.memory_space<vmem>>, vector<1x32x32xf32>
    %50 = vector.shape_cast %49 : vector<1x32x32xf32> to vector<32x32xf32>
    %cst_26 = arith.constant 0.000000e+00 : f32
    %51 = vector.broadcast %cst_26 : f32 to vector<32x32xf32>
    %52 = vector.extract_strided_slice %48 {offsets = [0, 0], sizes = [32, 16], strides = [1, 1]} : vector<32x96xf32> to vector<32x16xf32>
    %53 = vector.shape_cast %52 : vector<32x16xf32> to vector<2x16x16xf32>
    %54 = vector.extract_strided_slice %48 {offsets = [0, 32], sizes = [32, 16], strides = [1, 1]} : vector<32x96xf32> to vector<32x16xf32>
    %55 = vector.shape_cast %54 : vector<32x16xf32> to vector<2x16x16xf32>
    %56 = vector.extract_strided_slice %48 {offsets = [0, 64], sizes = [32, 16], strides = [1, 1]} : vector<32x96xf32> to vector<32x16xf32>
    %57 = vector.shape_cast %56 : vector<32x16xf32> to vector<2x16x16xf32>
    %58 = arith.truncf %53 : vector<2x16x16xf32> to vector<2x16x16xbf16>
    %59 = arith.truncf %55 : vector<2x16x16xf32> to vector<2x16x16xbf16>
    "tpu.trace_start"() <{level = 10 : i32, message = "bqd,bkd->bqk"}> : () -> ()
    %cst_27 = arith.constant dense<0.000000e+00> : vector<2x16x16xf32>
    %60 = tpu.matmul %58, %59, %cst_27 {dimension_numbers = #tpu.dot_dimension_numbers<[2], [2], [1], [1], [0, 0, 0, 1, 1, 1], [0], [0]>} : vector<2x16x16xbf16>, vector<2x16x16xbf16>, vector<2x16x16xf32> -> vector<2x16x16xf32>
    "tpu.trace_stop"() : () -> ()
    %cst_28 = arith.constant 2.500000e-01 : f32
    %61 = vector.broadcast %cst_28 : f32 to vector<2x16x16xf32>
    %62 = arith.mulf %60, %61 : vector<2x16x16xf32>
    %63 = vector.shape_cast %10 : vector<16x16xf32> to vector<1x16x16xf32>
    %64 = vector.broadcast %63 : vector<1x16x16xf32> to vector<2x16x16xf32>
    %65 = arith.addf %62, %64 : vector<2x16x16xf32>
    %cst_29 = arith.constant dense<0xFF800000> : vector<2x16xf32>
    %66 = vector.multi_reduction <maximumf>, %65, %cst_29 [2] : vector<2x16x16xf32> to vector<2x16xf32>
    %67 = vector.shape_cast %66 : vector<2x16xf32> to vector<2x16x1xf32>
    %68 = vector.broadcast %67 : vector<2x16x1xf32> to vector<2x16x16xf32>
    %69 = arith.subf %65, %68 : vector<2x16x16xf32>
    %70 = math.exp %69 : vector<2x16x16xf32>
    %cst_30 = arith.constant dense<0.000000e+00> : vector<2x16xf32>
    %71 = vector.multi_reduction <add>, %70, %cst_30 [2] : vector<2x16x16xf32> to vector<2x16xf32>
    %72 = vector.shape_cast %71 : vector<2x16xf32> to vector<2x16x1xf32>
    %73 = tpu.reciprocal %72 {approx = true} : vector<2x16x1xf32> -> vector<2x16x1xf32>
    %74 = vector.broadcast %73 : vector<2x16x1xf32> to vector<2x16x16xf32>
    %75 = arith.mulf %70, %74 : vector<2x16x16xf32>
    %76 = arith.truncf %75 : vector<2x16x16xf32> to vector<2x16x16xbf16>
    %77 = arith.truncf %57 : vector<2x16x16xf32> to vector<2x16x16xbf16>
    "tpu.trace_start"() <{level = 10 : i32, message = "bqk,bkd->bqd"}> : () -> ()
    %cst_31 = arith.constant dense<0.000000e+00> : vector<2x16x16xf32>
    %78 = tpu.matmul %76, %77, %cst_31 {dimension_numbers = #tpu.dot_dimension_numbers<[2], [1], [1], [2], [0, 0, 0, 1, 1, 2], [0], [0]>} : vector<2x16x16xbf16>, vector<2x16x16xbf16>, vector<2x16x16xf32> -> vector<2x16x16xf32>
    "tpu.trace_stop"() : () -> ()
    %79 = vector.shape_cast %78 : vector<2x16x16xf32> to vector<32x16xf32>
    %80 = vector.extract_strided_slice %50 {offsets = [0, 0], sizes = [16, 32], strides = [1, 1]} : vector<32x32xf32> to vector<16x32xf32>
    %81 = arith.truncf %79 : vector<32x16xf32> to vector<32x16xbf16>
    %82 = arith.truncf %80 : vector<16x32xf32> to vector<16x32xbf16>
    %cst_32 = arith.constant dense<0.000000e+00> : vector<32x32xf32>
    %83 = tpu.matmul %81, %82, %cst_32 {dimension_numbers = #tpu.dot_dimension_numbers<[1], [0], [0], [1], [0, 0, 1, 1], [], []>} : vector<32x16xbf16>, vector<16x32xbf16>, vector<32x32xf32> -> vector<32x32xf32>
    %84 = arith.addf %51, %83 : vector<32x32xf32>
    %85 = vector.extract_strided_slice %48 {offsets = [0, 16], sizes = [32, 16], strides = [1, 1]} : vector<32x96xf32> to vector<32x16xf32>
    %86 = vector.shape_cast %85 : vector<32x16xf32> to vector<2x16x16xf32>
    %87 = vector.extract_strided_slice %48 {offsets = [0, 48], sizes = [32, 16], strides = [1, 1]} : vector<32x96xf32> to vector<32x16xf32>
    %88 = vector.shape_cast %87 : vector<32x16xf32> to vector<2x16x16xf32>
    %89 = vector.extract_strided_slice %48 {offsets = [0, 80], sizes = [32, 16], strides = [1, 1]} : vector<32x96xf32> to vector<32x16xf32>
    %90 = vector.shape_cast %89 : vector<32x16xf32> to vector<2x16x16xf32>
    %91 = arith.truncf %86 : vector<2x16x16xf32> to vector<2x16x16xbf16>
    %92 = arith.truncf %88 : vector<2x16x16xf32> to vector<2x16x16xbf16>
    "tpu.trace_start"() <{level = 10 : i32, message = "bqd,bkd->bqk"}> : () -> ()
    %cst_33 = arith.constant dense<0.000000e+00> : vector<2x16x16xf32>
    %93 = tpu.matmul %91, %92, %cst_33 {dimension_numbers = #tpu.dot_dimension_numbers<[2], [2], [1], [1], [0, 0, 0, 1, 1, 1], [0], [0]>} : vector<2x16x16xbf16>, vector<2x16x16xbf16>, vector<2x16x16xf32> -> vector<2x16x16xf32>
    "tpu.trace_stop"() : () -> ()
    %cst_34 = arith.constant 2.500000e-01 : f32
    %94 = vector.broadcast %cst_34 : f32 to vector<2x16x16xf32>
    %95 = arith.mulf %93, %94 : vector<2x16x16xf32>
    %96 = vector.shape_cast %10 : vector<16x16xf32> to vector<1x16x16xf32>
    %97 = vector.broadcast %96 : vector<1x16x16xf32> to vector<2x16x16xf32>
    %98 = arith.addf %95, %97 : vector<2x16x16xf32>
    %cst_35 = arith.constant dense<0xFF800000> : vector<2x16xf32>
    %99 = vector.multi_reduction <maximumf>, %98, %cst_35 [2] : vector<2x16x16xf32> to vector<2x16xf32>
    %100 = vector.shape_cast %99 : vector<2x16xf32> to vector<2x16x1xf32>
    %101 = vector.broadcast %100 : vector<2x16x1xf32> to vector<2x16x16xf32>
    %102 = arith.subf %98, %101 : vector<2x16x16xf32>
    %103 = math.exp %102 : vector<2x16x16xf32>
    %cst_36 = arith.constant dense<0.000000e+00> : vector<2x16xf32>
    %104 = vector.multi_reduction <add>, %103, %cst_36 [2] : vector<2x16x16xf32> to vector<2x16xf32>
    %105 = vector.shape_cast %104 : vector<2x16xf32> to vector<2x16x1xf32>
    %106 = tpu.reciprocal %105 {approx = true} : vector<2x16x1xf32> -> vector<2x16x1xf32>
    %107 = vector.broadcast %106 : vector<2x16x1xf32> to vector<2x16x16xf32>
    %108 = arith.mulf %103, %107 : vector<2x16x16xf32>
    %109 = arith.truncf %108 : vector<2x16x16xf32> to vector<2x16x16xbf16>
    %110 = arith.truncf %90 : vector<2x16x16xf32> to vector<2x16x16xbf16>
    "tpu.trace_start"() <{level = 10 : i32, message = "bqk,bkd->bqd"}> : () -> ()
    %cst_37 = arith.constant dense<0.000000e+00> : vector<2x16x16xf32>
    %111 = tpu.matmul %109, %110, %cst_37 {dimension_numbers = #tpu.dot_dimension_numbers<[2], [1], [1], [2], [0, 0, 0, 1, 1, 2], [0], [0]>} : vector<2x16x16xbf16>, vector<2x16x16xbf16>, vector<2x16x16xf32> -> vector<2x16x16xf32>
    "tpu.trace_stop"() : () -> ()
    %112 = vector.shape_cast %111 : vector<2x16x16xf32> to vector<32x16xf32>
    %113 = vector.extract_strided_slice %50 {offsets = [16, 0], sizes = [16, 32], strides = [1, 1]} : vector<32x32xf32> to vector<16x32xf32>
    %114 = arith.truncf %112 : vector<32x16xf32> to vector<32x16xbf16>
    %115 = arith.truncf %113 : vector<16x32xf32> to vector<16x32xbf16>
    %cst_38 = arith.constant dense<0.000000e+00> : vector<32x32xf32>
    %116 = tpu.matmul %114, %115, %cst_38 {dimension_numbers = #tpu.dot_dimension_numbers<[1], [0], [0], [1], [0, 0, 1, 1], [], []>} : vector<32x16xbf16>, vector<16x32xbf16>, vector<32x32xf32> -> vector<32x32xf32>
    %117 = arith.addf %84, %116 : vector<32x32xf32>
    %c0_39 = arith.constant 0 : index
    %c0_40 = arith.constant 0 : index
    %c0_41 = arith.constant 0 : index
    %118 = vector.load %arg9[%c0_39, %c0_40, %c0_41] : memref<2x1x32xf32, #tpu.memory_space<vmem>>, vector<1x1x32xf32>
    %119 = vector.shape_cast %118 : vector<1x1x32xf32> to vector<1x32xf32>
    %120 = vector.broadcast %119 : vector<1x32xf32> to vector<32x32xf32>
    %121 = arith.addf %117, %120 : vector<32x32xf32>
    %122 = vector.shape_cast %121 : vector<32x32xf32> to vector<2x16x32xf32>
    %123 = arith.addf %4, %122 : vector<2x16x32xf32>
    %c0_42 = arith.constant 0 : index
    %c0_43 = arith.constant 0 : index
    %c0_44 = arith.constant 0 : index
    %124 = vector.load %arg10[%c0_42, %c0_43, %c0_44] : memref<2x1x32xf32, #tpu.memory_space<vmem>>, vector<1x1x32xf32>
    %125 = vector.shape_cast %124 : vector<1x1x32xf32> to vector<1x32xf32>
    %c0_45 = arith.constant 0 : index
    %c0_46 = arith.constant 0 : index
    %c0_47 = arith.constant 0 : index
    %126 = vector.load %arg11[%c0_45, %c0_46, %c0_47] : memref<2x1x32xf32, #tpu.memory_space<vmem>>, vector<1x1x32xf32>
    %127 = vector.shape_cast %126 : vector<1x1x32xf32> to vector<1x32xf32>
    %cst_48 = arith.constant dense<0.000000e+00> : vector<2x16xf32>
    %128 = vector.multi_reduction <add>, %123, %cst_48 [2] : vector<2x16x32xf32> to vector<2x16xf32>
    %129 = vector.shape_cast %128 : vector<2x16xf32> to vector<2x16x1xf32>
    %cst_49 = arith.constant 3.200000e+01 : f32
    %130 = vector.broadcast %cst_49 : f32 to vector<2x16x1xf32>
    %131 = arith.divf %129, %130 : vector<2x16x1xf32>
    %132 = vector.broadcast %131 : vector<2x16x1xf32> to vector<2x16x32xf32>
    %133 = arith.subf %123, %132 : vector<2x16x32xf32>
    %134 = arith.mulf %133, %133 : vector<2x16x32xf32>
    %cst_50 = arith.constant dense<0.000000e+00> : vector<2x16xf32>
    %135 = vector.multi_reduction <add>, %134, %cst_50 [2] : vector<2x16x32xf32> to vector<2x16xf32>
    %136 = vector.shape_cast %135 : vector<2x16xf32> to vector<2x16x1xf32>
    %cst_51 = arith.constant 3.200000e+01 : f32
    %137 = vector.broadcast %cst_51 : f32 to vector<2x16x1xf32>
    %138 = arith.divf %136, %137 : vector<2x16x1xf32>
    %139 = vector.broadcast %131 : vector<2x16x1xf32> to vector<2x16x32xf32>
    %140 = arith.subf %123, %139 : vector<2x16x32xf32>
    %cst_52 = arith.constant 9.99999974E-6 : f32
    %141 = vector.broadcast %cst_52 : f32 to vector<2x16x1xf32>
    %142 = arith.addf %138, %141 : vector<2x16x1xf32>
    %143 = math.rsqrt %142 : vector<2x16x1xf32>
    %144 = vector.broadcast %143 : vector<2x16x1xf32> to vector<2x16x32xf32>
    %145 = arith.mulf %140, %144 : vector<2x16x32xf32>
    %146 = vector.shape_cast %125 : vector<1x32xf32> to vector<1x1x32xf32>
    %147 = vector.broadcast %146 : vector<1x1x32xf32> to vector<2x16x32xf32>
    %148 = arith.mulf %145, %147 : vector<2x16x32xf32>
    %149 = vector.shape_cast %127 : vector<1x32xf32> to vector<1x1x32xf32>
    %150 = vector.broadcast %149 : vector<1x1x32xf32> to vector<2x16x32xf32>
    %151 = arith.addf %148, %150 : vector<2x16x32xf32>
    %152 = vector.shape_cast %151 : vector<2x16x32xf32> to vector<32x32xf32>
    %c0_53 = arith.constant 0 : index
    %c0_54 = arith.constant 0 : index
    %c0_55 = arith.constant 0 : index
    %153 = vector.load %arg12[%c0_53, %c0_54, %c0_55] : memref<2x32x128xf32, #tpu.memory_space<vmem>>, vector<1x32x128xf32>
    %154 = vector.shape_cast %153 : vector<1x32x128xf32> to vector<32x128xf32>
    %155 = arith.truncf %152 : vector<32x32xf32> to vector<32x32xbf16>
    %156 = arith.truncf %154 : vector<32x128xf32> to vector<32x128xbf16>
    %cst_56 = arith.constant dense<0.000000e+00> : vector<32x128xf32>
    %157 = tpu.matmul %155, %156, %cst_56 {dimension_numbers = #tpu.dot_dimension_numbers<[1], [0], [0], [1], [0, 0, 1, 1], [], []>} : vector<32x32xbf16>, vector<32x128xbf16>, vector<32x128xf32> -> vector<32x128xf32>
    %c0_57 = arith.constant 0 : index
    %c0_58 = arith.constant 0 : index
    %c0_59 = arith.constant 0 : index
    %158 = vector.load %arg13[%c0_57, %c0_58, %c0_59] : memref<2x1x128xf32, #tpu.memory_space<vmem>>, vector<1x1x128xf32>
    %159 = vector.shape_cast %158 : vector<1x1x128xf32> to vector<1x128xf32>
    %160 = vector.broadcast %159 : vector<1x128xf32> to vector<32x128xf32>
    %161 = arith.addf %157, %160 : vector<32x128xf32>
    %cst_60 = arith.constant 1.702000e+00 : f32
    %162 = vector.broadcast %cst_60 : f32 to vector<32x128xf32>
    %163 = arith.mulf %162, %161 : vector<32x128xf32>
    %164 = arith.negf %163 : vector<32x128xf32>
    %165 = math.exp %164 : vector<32x128xf32>
    %cst_61 = arith.constant 1.000000e+00 : f32
    %166 = vector.broadcast %cst_61 : f32 to vector<32x128xf32>
    %167 = arith.addf %166, %165 : vector<32x128xf32>
    %168 = arith.divf %166, %167 : vector<32x128xf32>
    %169 = arith.mulf %161, %168 : vector<32x128xf32>
    %c0_62 = arith.constant 0 : index
    %c0_63 = arith.constant 0 : index
    %c0_64 = arith.constant 0 : index
    %170 = vector.load %arg14[%c0_62, %c0_63, %c0_64] : memref<2x128x32xf32, #tpu.memory_space<vmem>>, vector<1x128x32xf32>
    %171 = vector.shape_cast %170 : vector<1x128x32xf32> to vector<128x32xf32>
    %172 = arith.truncf %169 : vector<32x128xf32> to vector<32x128xbf16>
    %173 = arith.truncf %171 : vector<128x32xf32> to vector<128x32xbf16>
    %cst_65 = arith.constant dense<0.000000e+00> : vector<32x32xf32>
    %174 = tpu.matmul %172, %173, %cst_65 {dimension_numbers = #tpu.dot_dimension_numbers<[1], [0], [0], [1], [0, 0, 1, 1], [], []>} : vector<32x128xbf16>, vector<128x32xbf16>, vector<32x32xf32> -> vector<32x32xf32>
    %c0_66 = arith.constant 0 : index
    %c0_67 = arith.constant 0 : index
    %c0_68 = arith.constant 0 : index
    %175 = vector.load %arg15[%c0_66, %c0_67, %c0_68] : memref<2x1x32xf32, #tpu.memory_space<vmem>>, vector<1x1x32xf32>
    %176 = vector.shape_cast %175 : vector<1x1x32xf32> to vector<1x32xf32>
    %177 = vector.broadcast %176 : vector<1x32xf32> to vector<32x32xf32>
    %178 = arith.addf %174, %177 : vector<32x32xf32>
    %179 = vector.shape_cast %178 : vector<32x32xf32> to vector<2x16x32xf32>
    %180 = arith.addf %123, %179 : vector<2x16x32xf32>
    %c1 = arith.constant 1 : index
    %c0_69 = arith.constant 0 : index
    %c0_70 = arith.constant 0 : index
    %181 = vector.load %arg4[%c1, %c0_69, %c0_70] : memref<2x1x32xf32, #tpu.memory_space<vmem>>, vector<1x1x32xf32>
    %182 = vector.shape_cast %181 : vector<1x1x32xf32> to vector<1x32xf32>
    %c1_71 = arith.constant 1 : index
    %c0_72 = arith.constant 0 : index
    %c0_73 = arith.constant 0 : index
    %183 = vector.load %arg5[%c1_71, %c0_72, %c0_73] : memref<2x1x32xf32, #tpu.memory_space<vmem>>, vector<1x1x32xf32>
    %184 = vector.shape_cast %183 : vector<1x1x32xf32> to vector<1x32xf32>
    %cst_74 = arith.constant dense<0.000000e+00> : vector<2x16xf32>
    %185 = vector.multi_reduction <add>, %180, %cst_74 [2] : vector<2x16x32xf32> to vector<2x16xf32>
    %186 = vector.shape_cast %185 : vector<2x16xf32> to vector<2x16x1xf32>
    %cst_75 = arith.constant 3.200000e+01 : f32
    %187 = vector.broadcast %cst_75 : f32 to vector<2x16x1xf32>
    %188 = arith.divf %186, %187 : vector<2x16x1xf32>
    %189 = vector.broadcast %188 : vector<2x16x1xf32> to vector<2x16x32xf32>
    %190 = arith.subf %180, %189 : vector<2x16x32xf32>
    %191 = arith.mulf %190, %190 : vector<2x16x32xf32>
    %cst_76 = arith.constant dense<0.000000e+00> : vector<2x16xf32>
    %192 = vector.multi_reduction <add>, %191, %cst_76 [2] : vector<2x16x32xf32> to vector<2x16xf32>
    %193 = vector.shape_cast %192 : vector<2x16xf32> to vector<2x16x1xf32>
    %cst_77 = arith.constant 3.200000e+01 : f32
    %194 = vector.broadcast %cst_77 : f32 to vector<2x16x1xf32>
    %195 = arith.divf %193, %194 : vector<2x16x1xf32>
    %196 = vector.broadcast %188 : vector<2x16x1xf32> to vector<2x16x32xf32>
    %197 = arith.subf %180, %196 : vector<2x16x32xf32>
    %cst_78 = arith.constant 9.99999974E-6 : f32
    %198 = vector.broadcast %cst_78 : f32 to vector<2x16x1xf32>
    %199 = arith.addf %195, %198 : vector<2x16x1xf32>
    %200 = math.rsqrt %199 : vector<2x16x1xf32>
    %201 = vector.broadcast %200 : vector<2x16x1xf32> to vector<2x16x32xf32>
    %202 = arith.mulf %197, %201 : vector<2x16x32xf32>
    %203 = vector.shape_cast %182 : vector<1x32xf32> to vector<1x1x32xf32>
    %204 = vector.broadcast %203 : vector<1x1x32xf32> to vector<2x16x32xf32>
    %205 = arith.mulf %202, %204 : vector<2x16x32xf32>
    %206 = vector.shape_cast %184 : vector<1x32xf32> to vector<1x1x32xf32>
    %207 = vector.broadcast %206 : vector<1x1x32xf32> to vector<2x16x32xf32>
    %208 = arith.addf %205, %207 : vector<2x16x32xf32>
    %209 = vector.shape_cast %208 : vector<2x16x32xf32> to vector<32x32xf32>
    %c1_79 = arith.constant 1 : index
    %c0_80 = arith.constant 0 : index
    %c0_81 = arith.constant 0 : index
    %210 = vector.load %arg6[%c1_79, %c0_80, %c0_81] : memref<2x32x96xf32, #tpu.memory_space<vmem>>, vector<1x32x96xf32>
    %211 = vector.shape_cast %210 : vector<1x32x96xf32> to vector<32x96xf32>
    %212 = arith.truncf %209 : vector<32x32xf32> to vector<32x32xbf16>
    %213 = arith.truncf %211 : vector<32x96xf32> to vector<32x96xbf16>
    %cst_82 = arith.constant dense<0.000000e+00> : vector<32x96xf32>
    %214 = tpu.matmul %212, %213, %cst_82 {dimension_numbers = #tpu.dot_dimension_numbers<[1], [0], [0], [1], [0, 0, 1, 1], [], []>} : vector<32x32xbf16>, vector<32x96xbf16>, vector<32x96xf32> -> vector<32x96xf32>
    %c1_83 = arith.constant 1 : index
    %c0_84 = arith.constant 0 : index
    %c0_85 = arith.constant 0 : index
    %215 = vector.load %arg7[%c1_83, %c0_84, %c0_85] : memref<2x1x96xf32, #tpu.memory_space<vmem>>, vector<1x1x96xf32>
    %216 = vector.shape_cast %215 : vector<1x1x96xf32> to vector<1x96xf32>
    %217 = vector.broadcast %216 : vector<1x96xf32> to vector<32x96xf32>
    %218 = arith.addf %214, %217 : vector<32x96xf32>
    %c1_86 = arith.constant 1 : index
    %c0_87 = arith.constant 0 : index
    %c0_88 = arith.constant 0 : index
    %219 = vector.load %arg8[%c1_86, %c0_87, %c0_88] : memref<2x32x32xf32, #tpu.memory_space<vmem>>, vector<1x32x32xf32>
    %220 = vector.shape_cast %219 : vector<1x32x32xf32> to vector<32x32xf32>
    %cst_89 = arith.constant 0.000000e+00 : f32
    %221 = vector.broadcast %cst_89 : f32 to vector<32x32xf32>
    %222 = vector.extract_strided_slice %218 {offsets = [0, 0], sizes = [32, 16], strides = [1, 1]} : vector<32x96xf32> to vector<32x16xf32>
    %223 = vector.shape_cast %222 : vector<32x16xf32> to vector<2x16x16xf32>
    %224 = vector.extract_strided_slice %218 {offsets = [0, 32], sizes = [32, 16], strides = [1, 1]} : vector<32x96xf32> to vector<32x16xf32>
    %225 = vector.shape_cast %224 : vector<32x16xf32> to vector<2x16x16xf32>
    %226 = vector.extract_strided_slice %218 {offsets = [0, 64], sizes = [32, 16], strides = [1, 1]} : vector<32x96xf32> to vector<32x16xf32>
    %227 = vector.shape_cast %226 : vector<32x16xf32> to vector<2x16x16xf32>
    %228 = arith.truncf %223 : vector<2x16x16xf32> to vector<2x16x16xbf16>
    %229 = arith.truncf %225 : vector<2x16x16xf32> to vector<2x16x16xbf16>
    "tpu.trace_start"() <{level = 10 : i32, message = "bqd,bkd->bqk"}> : () -> ()
    %cst_90 = arith.constant dense<0.000000e+00> : vector<2x16x16xf32>
    %230 = tpu.matmul %228, %229, %cst_90 {dimension_numbers = #tpu.dot_dimension_numbers<[2], [2], [1], [1], [0, 0, 0, 1, 1, 1], [0], [0]>} : vector<2x16x16xbf16>, vector<2x16x16xbf16>, vector<2x16x16xf32> -> vector<2x16x16xf32>
    "tpu.trace_stop"() : () -> ()
    %cst_91 = arith.constant 2.500000e-01 : f32
    %231 = vector.broadcast %cst_91 : f32 to vector<2x16x16xf32>
    %232 = arith.mulf %230, %231 : vector<2x16x16xf32>
    %233 = vector.shape_cast %10 : vector<16x16xf32> to vector<1x16x16xf32>
    %234 = vector.broadcast %233 : vector<1x16x16xf32> to vector<2x16x16xf32>
    %235 = arith.addf %232, %234 : vector<2x16x16xf32>
    %cst_92 = arith.constant dense<0xFF800000> : vector<2x16xf32>
    %236 = vector.multi_reduction <maximumf>, %235, %cst_92 [2] : vector<2x16x16xf32> to vector<2x16xf32>
    %237 = vector.shape_cast %236 : vector<2x16xf32> to vector<2x16x1xf32>
    %238 = vector.broadcast %237 : vector<2x16x1xf32> to vector<2x16x16xf32>
    %239 = arith.subf %235, %238 : vector<2x16x16xf32>
    %240 = math.exp %239 : vector<2x16x16xf32>
    %cst_93 = arith.constant dense<0.000000e+00> : vector<2x16xf32>
    %241 = vector.multi_reduction <add>, %240, %cst_93 [2] : vector<2x16x16xf32> to vector<2x16xf32>
    %242 = vector.shape_cast %241 : vector<2x16xf32> to vector<2x16x1xf32>
    %243 = tpu.reciprocal %242 {approx = true} : vector<2x16x1xf32> -> vector<2x16x1xf32>
    %244 = vector.broadcast %243 : vector<2x16x1xf32> to vector<2x16x16xf32>
    %245 = arith.mulf %240, %244 : vector<2x16x16xf32>
    %246 = arith.truncf %245 : vector<2x16x16xf32> to vector<2x16x16xbf16>
    %247 = arith.truncf %227 : vector<2x16x16xf32> to vector<2x16x16xbf16>
    "tpu.trace_start"() <{level = 10 : i32, message = "bqk,bkd->bqd"}> : () -> ()
    %cst_94 = arith.constant dense<0.000000e+00> : vector<2x16x16xf32>
    %248 = tpu.matmul %246, %247, %cst_94 {dimension_numbers = #tpu.dot_dimension_numbers<[2], [1], [1], [2], [0, 0, 0, 1, 1, 2], [0], [0]>} : vector<2x16x16xbf16>, vector<2x16x16xbf16>, vector<2x16x16xf32> -> vector<2x16x16xf32>
    "tpu.trace_stop"() : () -> ()
    %249 = vector.shape_cast %248 : vector<2x16x16xf32> to vector<32x16xf32>
    %250 = vector.extract_strided_slice %220 {offsets = [0, 0], sizes = [16, 32], strides = [1, 1]} : vector<32x32xf32> to vector<16x32xf32>
    %251 = arith.truncf %249 : vector<32x16xf32> to vector<32x16xbf16>
    %252 = arith.truncf %250 : vector<16x32xf32> to vector<16x32xbf16>
    %cst_95 = arith.constant dense<0.000000e+00> : vector<32x32xf32>
    %253 = tpu.matmul %251, %252, %cst_95 {dimension_numbers = #tpu.dot_dimension_numbers<[1], [0], [0], [1], [0, 0, 1, 1], [], []>} : vector<32x16xbf16>, vector<16x32xbf16>, vector<32x32xf32> -> vector<32x32xf32>
    %254 = arith.addf %221, %253 : vector<32x32xf32>
    %255 = vector.extract_strided_slice %218 {offsets = [0, 16], sizes = [32, 16], strides = [1, 1]} : vector<32x96xf32> to vector<32x16xf32>
    %256 = vector.shape_cast %255 : vector<32x16xf32> to vector<2x16x16xf32>
    %257 = vector.extract_strided_slice %218 {offsets = [0, 48], sizes = [32, 16], strides = [1, 1]} : vector<32x96xf32> to vector<32x16xf32>
    %258 = vector.shape_cast %257 : vector<32x16xf32> to vector<2x16x16xf32>
    %259 = vector.extract_strided_slice %218 {offsets = [0, 80], sizes = [32, 16], strides = [1, 1]} : vector<32x96xf32> to vector<32x16xf32>
    %260 = vector.shape_cast %259 : vector<32x16xf32> to vector<2x16x16xf32>
    %261 = arith.truncf %256 : vector<2x16x16xf32> to vector<2x16x16xbf16>
    %262 = arith.truncf %258 : vector<2x16x16xf32> to vector<2x16x16xbf16>
    "tpu.trace_start"() <{level = 10 : i32, message = "bqd,bkd->bqk"}> : () -> ()
    %cst_96 = arith.constant dense<0.000000e+00> : vector<2x16x16xf32>
    %263 = tpu.matmul %261, %262, %cst_96 {dimension_numbers = #tpu.dot_dimension_numbers<[2], [2], [1], [1], [0, 0, 0, 1, 1, 1], [0], [0]>} : vector<2x16x16xbf16>, vector<2x16x16xbf16>, vector<2x16x16xf32> -> vector<2x16x16xf32>
    "tpu.trace_stop"() : () -> ()
    %cst_97 = arith.constant 2.500000e-01 : f32
    %264 = vector.broadcast %cst_97 : f32 to vector<2x16x16xf32>
    %265 = arith.mulf %263, %264 : vector<2x16x16xf32>
    %266 = vector.shape_cast %10 : vector<16x16xf32> to vector<1x16x16xf32>
    %267 = vector.broadcast %266 : vector<1x16x16xf32> to vector<2x16x16xf32>
    %268 = arith.addf %265, %267 : vector<2x16x16xf32>
    %cst_98 = arith.constant dense<0xFF800000> : vector<2x16xf32>
    %269 = vector.multi_reduction <maximumf>, %268, %cst_98 [2] : vector<2x16x16xf32> to vector<2x16xf32>
    %270 = vector.shape_cast %269 : vector<2x16xf32> to vector<2x16x1xf32>
    %271 = vector.broadcast %270 : vector<2x16x1xf32> to vector<2x16x16xf32>
    %272 = arith.subf %268, %271 : vector<2x16x16xf32>
    %273 = math.exp %272 : vector<2x16x16xf32>
    %cst_99 = arith.constant dense<0.000000e+00> : vector<2x16xf32>
    %274 = vector.multi_reduction <add>, %273, %cst_99 [2] : vector<2x16x16xf32> to vector<2x16xf32>
    %275 = vector.shape_cast %274 : vector<2x16xf32> to vector<2x16x1xf32>
    %276 = tpu.reciprocal %275 {approx = true} : vector<2x16x1xf32> -> vector<2x16x1xf32>
    %277 = vector.broadcast %276 : vector<2x16x1xf32> to vector<2x16x16xf32>
    %278 = arith.mulf %273, %277 : vector<2x16x16xf32>
    %279 = arith.truncf %278 : vector<2x16x16xf32> to vector<2x16x16xbf16>
    %280 = arith.truncf %260 : vector<2x16x16xf32> to vector<2x16x16xbf16>
    "tpu.trace_start"() <{level = 10 : i32, message = "bqk,bkd->bqd"}> : () -> ()
    %cst_100 = arith.constant dense<0.000000e+00> : vector<2x16x16xf32>
    %281 = tpu.matmul %279, %280, %cst_100 {dimension_numbers = #tpu.dot_dimension_numbers<[2], [1], [1], [2], [0, 0, 0, 1, 1, 2], [0], [0]>} : vector<2x16x16xbf16>, vector<2x16x16xbf16>, vector<2x16x16xf32> -> vector<2x16x16xf32>
    "tpu.trace_stop"() : () -> ()
    %282 = vector.shape_cast %281 : vector<2x16x16xf32> to vector<32x16xf32>
    %283 = vector.extract_strided_slice %220 {offsets = [16, 0], sizes = [16, 32], strides = [1, 1]} : vector<32x32xf32> to vector<16x32xf32>
    %284 = arith.truncf %282 : vector<32x16xf32> to vector<32x16xbf16>
    %285 = arith.truncf %283 : vector<16x32xf32> to vector<16x32xbf16>
    %cst_101 = arith.constant dense<0.000000e+00> : vector<32x32xf32>
    %286 = tpu.matmul %284, %285, %cst_101 {dimension_numbers = #tpu.dot_dimension_numbers<[1], [0], [0], [1], [0, 0, 1, 1], [], []>} : vector<32x16xbf16>, vector<16x32xbf16>, vector<32x32xf32> -> vector<32x32xf32>
    %287 = arith.addf %254, %286 : vector<32x32xf32>
    %c1_102 = arith.constant 1 : index
    %c0_103 = arith.constant 0 : index
    %c0_104 = arith.constant 0 : index
    %288 = vector.load %arg9[%c1_102, %c0_103, %c0_104] : memref<2x1x32xf32, #tpu.memory_space<vmem>>, vector<1x1x32xf32>
    %289 = vector.shape_cast %288 : vector<1x1x32xf32> to vector<1x32xf32>
    %290 = vector.broadcast %289 : vector<1x32xf32> to vector<32x32xf32>
    %291 = arith.addf %287, %290 : vector<32x32xf32>
    %292 = vector.shape_cast %291 : vector<32x32xf32> to vector<2x16x32xf32>
    %293 = arith.addf %180, %292 : vector<2x16x32xf32>
    %c1_105 = arith.constant 1 : index
    %c0_106 = arith.constant 0 : index
    %c0_107 = arith.constant 0 : index
    %294 = vector.load %arg10[%c1_105, %c0_106, %c0_107] : memref<2x1x32xf32, #tpu.memory_space<vmem>>, vector<1x1x32xf32>
    %295 = vector.shape_cast %294 : vector<1x1x32xf32> to vector<1x32xf32>
    %c1_108 = arith.constant 1 : index
    %c0_109 = arith.constant 0 : index
    %c0_110 = arith.constant 0 : index
    %296 = vector.load %arg11[%c1_108, %c0_109, %c0_110] : memref<2x1x32xf32, #tpu.memory_space<vmem>>, vector<1x1x32xf32>
    %297 = vector.shape_cast %296 : vector<1x1x32xf32> to vector<1x32xf32>
    %cst_111 = arith.constant dense<0.000000e+00> : vector<2x16xf32>
    %298 = vector.multi_reduction <add>, %293, %cst_111 [2] : vector<2x16x32xf32> to vector<2x16xf32>
    %299 = vector.shape_cast %298 : vector<2x16xf32> to vector<2x16x1xf32>
    %cst_112 = arith.constant 3.200000e+01 : f32
    %300 = vector.broadcast %cst_112 : f32 to vector<2x16x1xf32>
    %301 = arith.divf %299, %300 : vector<2x16x1xf32>
    %302 = vector.broadcast %301 : vector<2x16x1xf32> to vector<2x16x32xf32>
    %303 = arith.subf %293, %302 : vector<2x16x32xf32>
    %304 = arith.mulf %303, %303 : vector<2x16x32xf32>
    %cst_113 = arith.constant dense<0.000000e+00> : vector<2x16xf32>
    %305 = vector.multi_reduction <add>, %304, %cst_113 [2] : vector<2x16x32xf32> to vector<2x16xf32>
    %306 = vector.shape_cast %305 : vector<2x16xf32> to vector<2x16x1xf32>
    %cst_114 = arith.constant 3.200000e+01 : f32
    %307 = vector.broadcast %cst_114 : f32 to vector<2x16x1xf32>
    %308 = arith.divf %306, %307 : vector<2x16x1xf32>
    %309 = vector.broadcast %301 : vector<2x16x1xf32> to vector<2x16x32xf32>
    %310 = arith.subf %293, %309 : vector<2x16x32xf32>
    %cst_115 = arith.constant 9.99999974E-6 : f32
    %311 = vector.broadcast %cst_115 : f32 to vector<2x16x1xf32>
    %312 = arith.addf %308, %311 : vector<2x16x1xf32>
    %313 = math.rsqrt %312 : vector<2x16x1xf32>
    %314 = vector.broadcast %313 : vector<2x16x1xf32> to vector<2x16x32xf32>
    %315 = arith.mulf %310, %314 : vector<2x16x32xf32>
    %316 = vector.shape_cast %295 : vector<1x32xf32> to vector<1x1x32xf32>
    %317 = vector.broadcast %316 : vector<1x1x32xf32> to vector<2x16x32xf32>
    %318 = arith.mulf %315, %317 : vector<2x16x32xf32>
    %319 = vector.shape_cast %297 : vector<1x32xf32> to vector<1x1x32xf32>
    %320 = vector.broadcast %319 : vector<1x1x32xf32> to vector<2x16x32xf32>
    %321 = arith.addf %318, %320 : vector<2x16x32xf32>
    %322 = vector.shape_cast %321 : vector<2x16x32xf32> to vector<32x32xf32>
    %c1_116 = arith.constant 1 : index
    %c0_117 = arith.constant 0 : index
    %c0_118 = arith.constant 0 : index
    %323 = vector.load %arg12[%c1_116, %c0_117, %c0_118] : memref<2x32x128xf32, #tpu.memory_space<vmem>>, vector<1x32x128xf32>
    %324 = vector.shape_cast %323 : vector<1x32x128xf32> to vector<32x128xf32>
    %325 = arith.truncf %322 : vector<32x32xf32> to vector<32x32xbf16>
    %326 = arith.truncf %324 : vector<32x128xf32> to vector<32x128xbf16>
    %cst_119 = arith.constant dense<0.000000e+00> : vector<32x128xf32>
    %327 = tpu.matmul %325, %326, %cst_119 {dimension_numbers = #tpu.dot_dimension_numbers<[1], [0], [0], [1], [0, 0, 1, 1], [], []>} : vector<32x32xbf16>, vector<32x128xbf16>, vector<32x128xf32> -> vector<32x128xf32>
    %c1_120 = arith.constant 1 : index
    %c0_121 = arith.constant 0 : index
    %c0_122 = arith.constant 0 : index
    %328 = vector.load %arg13[%c1_120, %c0_121, %c0_122] : memref<2x1x128xf32, #tpu.memory_space<vmem>>, vector<1x1x128xf32>
    %329 = vector.shape_cast %328 : vector<1x1x128xf32> to vector<1x128xf32>
    %330 = vector.broadcast %329 : vector<1x128xf32> to vector<32x128xf32>
    %331 = arith.addf %327, %330 : vector<32x128xf32>
    %cst_123 = arith.constant 1.702000e+00 : f32
    %332 = vector.broadcast %cst_123 : f32 to vector<32x128xf32>
    %333 = arith.mulf %332, %331 : vector<32x128xf32>
    %334 = arith.negf %333 : vector<32x128xf32>
    %335 = math.exp %334 : vector<32x128xf32>
    %cst_124 = arith.constant 1.000000e+00 : f32
    %336 = vector.broadcast %cst_124 : f32 to vector<32x128xf32>
    %337 = arith.addf %336, %335 : vector<32x128xf32>
    %338 = arith.divf %336, %337 : vector<32x128xf32>
    %339 = arith.mulf %331, %338 : vector<32x128xf32>
    %c1_125 = arith.constant 1 : index
    %c0_126 = arith.constant 0 : index
    %c0_127 = arith.constant 0 : index
    %340 = vector.load %arg14[%c1_125, %c0_126, %c0_127] : memref<2x128x32xf32, #tpu.memory_space<vmem>>, vector<1x128x32xf32>
    %341 = vector.shape_cast %340 : vector<1x128x32xf32> to vector<128x32xf32>
    %342 = arith.truncf %339 : vector<32x128xf32> to vector<32x128xbf16>
    %343 = arith.truncf %341 : vector<128x32xf32> to vector<128x32xbf16>
    %cst_128 = arith.constant dense<0.000000e+00> : vector<32x32xf32>
    %344 = tpu.matmul %342, %343, %cst_128 {dimension_numbers = #tpu.dot_dimension_numbers<[1], [0], [0], [1], [0, 0, 1, 1], [], []>} : vector<32x128xbf16>, vector<128x32xbf16>, vector<32x32xf32> -> vector<32x32xf32>
    %c1_129 = arith.constant 1 : index
    %c0_130 = arith.constant 0 : index
    %c0_131 = arith.constant 0 : index
    %345 = vector.load %arg15[%c1_129, %c0_130, %c0_131] : memref<2x1x32xf32, #tpu.memory_space<vmem>>, vector<1x1x32xf32>
    %346 = vector.shape_cast %345 : vector<1x1x32xf32> to vector<1x32xf32>
    %347 = vector.broadcast %346 : vector<1x32xf32> to vector<32x32xf32>
    %348 = arith.addf %344, %347 : vector<32x32xf32>
    %349 = vector.shape_cast %348 : vector<32x32xf32> to vector<2x16x32xf32>
    %350 = arith.addf %293, %349 : vector<2x16x32xf32>
    %c0_132 = arith.constant 0 : index
    %c0_133 = arith.constant 0 : index
    %351 = vector.load %arg16[%c0_132, %c0_133] : memref<1x32xf32, #tpu.memory_space<vmem>>, vector<1x32xf32>
    %c0_134 = arith.constant 0 : index
    %c0_135 = arith.constant 0 : index
    %352 = vector.load %arg17[%c0_134, %c0_135] : memref<1x32xf32, #tpu.memory_space<vmem>>, vector<1x32xf32>
    %cst_136 = arith.constant dense<0.000000e+00> : vector<2x16xf32>
    %353 = vector.multi_reduction <add>, %350, %cst_136 [2] : vector<2x16x32xf32> to vector<2x16xf32>
    %354 = vector.shape_cast %353 : vector<2x16xf32> to vector<2x16x1xf32>
    %cst_137 = arith.constant 3.200000e+01 : f32
    %355 = vector.broadcast %cst_137 : f32 to vector<2x16x1xf32>
    %356 = arith.divf %354, %355 : vector<2x16x1xf32>
    %357 = vector.broadcast %356 : vector<2x16x1xf32> to vector<2x16x32xf32>
    %358 = arith.subf %350, %357 : vector<2x16x32xf32>
    %359 = arith.mulf %358, %358 : vector<2x16x32xf32>
    %cst_138 = arith.constant dense<0.000000e+00> : vector<2x16xf32>
    %360 = vector.multi_reduction <add>, %359, %cst_138 [2] : vector<2x16x32xf32> to vector<2x16xf32>
    %361 = vector.shape_cast %360 : vector<2x16xf32> to vector<2x16x1xf32>
    %cst_139 = arith.constant 3.200000e+01 : f32
    %362 = vector.broadcast %cst_139 : f32 to vector<2x16x1xf32>
    %363 = arith.divf %361, %362 : vector<2x16x1xf32>
    %364 = vector.broadcast %356 : vector<2x16x1xf32> to vector<2x16x32xf32>
    %365 = arith.subf %350, %364 : vector<2x16x32xf32>
    %cst_140 = arith.constant 9.99999974E-6 : f32
    %366 = vector.broadcast %cst_140 : f32 to vector<2x16x1xf32>
    %367 = arith.addf %363, %366 : vector<2x16x1xf32>
    %368 = math.rsqrt %367 : vector<2x16x1xf32>
    %369 = vector.broadcast %368 : vector<2x16x1xf32> to vector<2x16x32xf32>
    %370 = arith.mulf %365, %369 : vector<2x16x32xf32>
    %371 = vector.shape_cast %351 : vector<1x32xf32> to vector<1x1x32xf32>
    %372 = vector.broadcast %371 : vector<1x1x32xf32> to vector<2x16x32xf32>
    %373 = arith.mulf %370, %372 : vector<2x16x32xf32>
    %374 = vector.shape_cast %352 : vector<1x32xf32> to vector<1x1x32xf32>
    %375 = vector.broadcast %374 : vector<1x1x32xf32> to vector<2x16x32xf32>
    %376 = arith.addf %373, %375 : vector<2x16x32xf32>
    %c0_141 = arith.constant 0 : index
    %c0_142 = arith.constant 0 : index
    %c0_143 = arith.constant 0 : index
    %377 = vector.load %arg2[%c0_141, %c0_142, %c0_143] : memref<2x16x1xf32, #tpu.memory_space<vmem>>, vector<2x16x1xf32>
    %378 = vector.broadcast %377 : vector<2x16x1xf32> to vector<2x16x32xf32>
    %379 = arith.mulf %376, %378 : vector<2x16x32xf32>
    %cst_144 = arith.constant dense<0.000000e+00> : vector<2x32xf32>
    %380 = vector.multi_reduction <add>, %379, %cst_144 [1] : vector<2x16x32xf32> to vector<2x32xf32>
    %c0_145 = arith.constant 0 : index
    %c0_146 = arith.constant 0 : index
    %381 = vector.load %arg18[%c0_145, %c0_146] : memref<32x32xf32, #tpu.memory_space<vmem>>, vector<32x32xf32>
    %382 = arith.truncf %380 : vector<2x32xf32> to vector<2x32xbf16>
    %383 = arith.truncf %381 : vector<32x32xf32> to vector<32x32xbf16>
    %cst_147 = arith.constant dense<0.000000e+00> : vector<2x32xf32>
    %384 = tpu.matmul %382, %383, %cst_147 {dimension_numbers = #tpu.dot_dimension_numbers<[1], [0], [0], [1], [0, 0, 1, 1], [], []>} : vector<2x32xbf16>, vector<32x32xbf16>, vector<2x32xf32> -> vector<2x32xf32>
    %385 = vector.shape_cast %384 : vector<2x32xf32> to vector<2x1x32xf32>
    %c0_148 = arith.constant 0 : index
    %c0_149 = arith.constant 0 : index
    %c0_150 = arith.constant 0 : index
    %386 = vector.load %arg19[%c0_148, %c0_149, %c0_150] : memref<2x1x32xf32, #tpu.memory_space<vmem>>, vector<2x1x32xf32>
    tpu.vector_store %arg19[%c0_148, %c0_149, %c0_150], %385 {strides = array<i32>} : memref<2x1x32xf32, #tpu.memory_space<vmem>>, vector<2x1x32xf32>,
    return
  }
  func.func @transform_0(%arg0: i32) -> (i32, i32, i32) {
    %c0_i32 = arith.constant 0 : i32
    %c0_i32_0 = arith.constant 0 : i32
    %c0_i32_1 = arith.constant 0 : i32
    return %arg0, %c0_i32, %c0_i32_0 : i32, i32, i32
  }
  func.func @transform_1(%arg0: i32) -> (i32, i32, i32) {
    %c0_i32 = arith.constant 0 : i32
    %c0_i32_0 = arith.constant 0 : i32
    %c0_i32_1 = arith.constant 0 : i32
    return %arg0, %c0_i32, %c0_i32_0 : i32, i32, i32
  }
  func.func @transform_2(%arg0: i32) -> (i32, i32) {
    %c0_i32 = arith.constant 0 : i32
    %c0_i32_0 = arith.constant 0 : i32
    %c0_i32_1 = arith.constant 0 : i32
    return %c0_i32, %c0_i32_0 : i32, i32
  }
  func.func @transform_3(%arg0: i32) -> (i32, i32, i32) {
    %c0_i32 = arith.constant 0 : i32
    %c0_i32_0 = arith.constant 0 : i32
    %c0_i32_1 = arith.constant 0 : i32
    %c0_i32_2 = arith.constant 0 : i32
    return %c0_i32, %c0_i32_0, %c0_i32_1 : i32, i32, i32
  }
  func.func @transform_4(%arg0: i32) -> (i32, i32, i32) {
    %c0_i32 = arith.constant 0 : i32
    %c0_i32_0 = arith.constant 0 : i32
    %c0_i32_1 = arith.constant 0 : i32
    %c0_i32_2 = arith.constant 0 : i32
    return %c0_i32, %c0_i32_0, %c0_i32_1 : i32, i32, i32
  }
  func.func @transform_5(%arg0: i32) -> (i32, i32, i32) {
    %c0_i32 = arith.constant 0 : i32
    %c0_i32_0 = arith.constant 0 : i32
    %c0_i32_1 = arith.constant 0 : i32
    %c0_i32_2 = arith.constant 0 : i32
    return %c0_i32, %c0_i32_0, %c0_i32_1 : i32, i32, i32
  }
  func.func @transform_6(%arg0: i32) -> (i32, i32, i32) {
    %c0_i32 = arith.constant 0 : i32
    %c0_i32_0 = arith.constant 0 : i32
    %c0_i32_1 = arith.constant 0 : i32
    %c0_i32_2 = arith.constant 0 : i32
    return %c0_i32, %c0_i32_0, %c0_i32_1 : i32, i32, i32
  }
  func.func @transform_7(%arg0: i32) -> (i32, i32, i32) {
    %c0_i32 = arith.constant 0 : i32
    %c0_i32_0 = arith.constant 0 : i32
    %c0_i32_1 = arith.constant 0 : i32
    %c0_i32_2 = arith.constant 0 : i32
    return %c0_i32, %c0_i32_0, %c0_i32_1 : i32, i32, i32
  }
  func.func @transform_8(%arg0: i32) -> (i32, i32, i32) {
    %c0_i32 = arith.constant 0 : i32
    %c0_i32_0 = arith.constant 0 : i32
    %c0_i32_1 = arith.constant 0 : i32
    %c0_i32_2 = arith.constant 0 : i32
    return %c0_i32, %c0_i32_0, %c0_i32_1 : i32, i32, i32
  }
  func.func @transform_9(%arg0: i32) -> (i32, i32, i32) {
    %c0_i32 = arith.constant 0 : i32
    %c0_i32_0 = arith.constant 0 : i32
    %c0_i32_1 = arith.constant 0 : i32
    %c0_i32_2 = arith.constant 0 : i32
    return %c0_i32, %c0_i32_0, %c0_i32_1 : i32, i32, i32
  }
  func.func @transform_10(%arg0: i32) -> (i32, i32, i32) {
    %c0_i32 = arith.constant 0 : i32
    %c0_i32_0 = arith.constant 0 : i32
    %c0_i32_1 = arith.constant 0 : i32
    %c0_i32_2 = arith.constant 0 : i32
    return %c0_i32, %c0_i32_0, %c0_i32_1 : i32, i32, i32
  }
  func.func @transform_11(%arg0: i32) -> (i32, i32, i32) {
    %c0_i32 = arith.constant 0 : i32
    %c0_i32_0 = arith.constant 0 : i32
    %c0_i32_1 = arith.constant 0 : i32
    %c0_i32_2 = arith.constant 0 : i32
    return %c0_i32, %c0_i32_0, %c0_i32_1 : i32, i32, i32
  }
  func.func @transform_12(%arg0: i32) -> (i32, i32, i32) {
    %c0_i32 = arith.constant 0 : i32
    %c0_i32_0 = arith.constant 0 : i32
    %c0_i32_1 = arith.constant 0 : i32
    %c0_i32_2 = arith.constant 0 : i32
    return %c0_i32, %c0_i32_0, %c0_i32_1 : i32, i32, i32
  }
  func.func @transform_13(%arg0: i32) -> (i32, i32, i32) {
    %c0_i32 = arith.constant 0 : i32
    %c0_i32_0 = arith.constant 0 : i32
    %c0_i32_1 = arith.constant 0 : i32
    %c0_i32_2 = arith.constant 0 : i32
    return %c0_i32, %c0_i32_0, %c0_i32_1 : i32, i32, i32
  }
  func.func @transform_14(%arg0: i32) -> (i32, i32, i32) {
    %c0_i32 = arith.constant 0 : i32
    %c0_i32_0 = arith.constant 0 : i32
    %c0_i32_1 = arith.constant 0 : i32
    %c0_i32_2 = arith.constant 0 : i32
    return %c0_i32, %c0_i32_0, %c0_i32_1 : i32, i32, i32
  }
  func.func @transform_15(%arg0: i32) -> (i32, i32) {
    %c0_i32 = arith.constant 0 : i32
    %c0_i32_0 = arith.constant 0 : i32
    %c0_i32_1 = arith.constant 0 : i32
    return %c0_i32, %c0_i32_0 : i32, i32
  }
  func.func @transform_16(%arg0: i32) -> (i32, i32) {
    %c0_i32 = arith.constant 0 : i32
    %c0_i32_0 = arith.constant 0 : i32
    %c0_i32_1 = arith.constant 0 : i32
    return %c0_i32, %c0_i32_0 : i32, i32
  }
  func.func @transform_17(%arg0: i32) -> (i32, i32) {
    %c0_i32 = arith.constant 0 : i32
    %c0_i32_0 = arith.constant 0 : i32
    %c0_i32_1 = arith.constant 0 : i32
    return %c0_i32, %c0_i32_0 : i32, i32
  }
  func.func @transform_18(%arg0: i32) -> (i32, i32, i32) {
    %c0_i32 = arith.constant 0 : i32
    %c0_i32_0 = arith.constant 0 : i32
    %c0_i32_1 = arith.constant 0 : i32
    return %arg0, %c0_i32, %c0_i32_0 : i32, i32, i32
  }
}

</mosaic_0001>

<bundles_post_ra>
// kernel: text_encoder_forward.1
= control target key start
LH: loop header
LB: loop body
LE: loop exit
PB: predicated region body
PF: predicated region fallthrough
CT: control target
= control target key end

     0   :  { %s4485_s0 = inlined_call_operand.vmem [shape: f32[4,16,32], index: 0, kind: input, shape index: {}]   ;;  %s4486_s1 = inlined_call_operand.vmem [shape: f32[4,16,1], index: 1, kind: input, shape index: {}]   ;;  %s4487_s2 = inlined_call_operand.vmem [shape: f32[16,32], index: 2, kind: input, shape index: {}]   ;;  %s4488_s3 = inlined_call_operand.vmem [shape: f32[2,1,32], index: 3, kind: input, shape index: {}]   ;;  %s4489_s4 = inlined_call_operand.vmem [shape: f32[2,1,32], index: 4, kind: input, shape index: {}]   ;;  %s4490_s5 = inlined_call_operand.vmem [shape: f32[2,32,96], index: 5, kind: input, shape index: {}]   ;;  %s4491_s6 = inlined_call_operand.vmem [shape: f32[2,1,96], index: 6, kind: input, shape index: {}]   ;;  %s4492_s7 = inlined_call_operand.vmem [shape: f32[2,32,32], index: 7, kind: input, shape index: {}]   ;;  %s4493_s8 = inlined_call_operand.vmem [shape: f32[2,1,32], index: 8, kind: input, shape index: {}]   ;;  %s4494_s9 = inlined_call_operand.vmem [shape: f32[2,1,32], index: 9, kind: input, shape index: {}]   ;;  %s4495_s10 = inlined_call_operand.vmem [shape: f32[2,1,32], index: 10, kind: input, shape index: {}]   ;;  %s4496_s11 = inlined_call_operand.vmem [shape: f32[2,32,128], index: 11, kind: input, shape index: {}]   ;;  %s4497_s12 = inlined_call_operand.vmem [shape: f32[2,1,128], index: 12, kind: input, shape index: {}]   ;;  %s4498_s13 = inlined_call_operand.vmem [shape: f32[2,128,32], index: 13, kind: input, shape index: {}]   ;;  %s4499_s14 = inlined_call_operand.vmem [shape: f32[2,1,32], index: 14, kind: input, shape index: {}]   ;;  %s4500_s15 = inlined_call_operand.vmem [shape: f32[1,32], index: 15, kind: input, shape index: {}]   ;;  %s4501_s16 = inlined_call_operand.vmem [shape: f32[1,32], index: 16, kind: input, shape index: {}]   ;;  %s4502_s17 = inlined_call_operand.vmem [shape: f32[32,32], index: 17, kind: input, shape index: {}]   ;;  %s4503_s18 = inlined_call_operand.hbm [shape: f32[4,1,32], index: 18, kind: output, shape index: {}]  }
   0x1   :  { %4519 = sst [smem:[#allocation10_spill]] %s4485_s0 }
   0x2   :  { %4520 = sst [smem:[#allocation11_spill]] %s4486_s1 }
   0x3   :  { %4521 = sst [smem:[#allocation12_spill]] %s4487_s2 }
   0x4   :  { %4522 = sst [smem:[#allocation13_spill]] %s4488_s3 }
   0x5   :  { %23 = vsyncpa [#allocation3], 0 }
   0x6   :  { %25 = vsyncpa [#allocation3 + $0x1], 0  ;;  %s3772_s27 = smov 0   ;;  %s3774_s28 = smov 0  }
   0x7   :  { %s3776_s29 = smov 0   ;;  %s3778_s30 = smov 0  }
   0x8 LB: > { %4523 = sst [smem:[#allocation5_spill]] %s3650_s27  ;;  %s3793_s0 = sadd.s32 4294967295, %s3662_s30   ;;  %s3662_s30 = sphi %s3778_s30, %s4541_s30   ;;  %s3658_s29 = sphi %s3776_s29, %s4546_s29   ;;  %s3654_s28 = sphi %s3774_s28, %s4545_s28   ;;  %s3650_s27 = sphi %s3772_s27, %s4544_s27  }
   0x9   : > { %4524 = sst [smem:[#allocation6_spill]] %s3658_s29  ;;  %s3016_s19 = sadd.s32 4294967294, %s3662_s30  }
   0xa   : > { %s3797_s1 = sadd.s32 1, %s3662_s30   ;;  %s426_s20 = sadd.s32 1, %s3658_s29 }
   0xb   : > { %4525 = sst [smem:[#allocation7_spill]] %s3797_s1  ;;  %s423_s21 = ssub.s32 %s3662_s30, %s3797_s1 }
   0xc   : > { %p436_p0 = scmp.ne.s32.totalorder %s3658_s29, %s3654_s28  ;;  %p424_p1 = scmp.eq.s32.totalorder %s423_s21, 0 }
   0xd   : > { %p437_p2 = scmp.eq.s32.totalorder %s3793_s0, 1  ;;  %p442_p3 = scmp.ne.s32.totalorder %s3654_s28, %s3650_s27 }
   0xe   : > { %p443_p4 = scmp.eq.s32.totalorder %s3016_s19, 1  ;;  %p3019_p7 = scmp.ge.s32.totalorder %s3662_s30, 1 }
   0xf   : > { %s3808_s22 = scalar_select %p424_p1, %s3658_s29, %s426_s20  }
  0x10   : > { %p3810_p5 = por %p437_p2, %p436_p0  ;;  %p3814_p6 = por %p443_p4, %p442_p3 }
  0x11   : > { %4526 = sst [smem:[#allocation8_spill]] %s3808_s22  ;;  %p529_p8 = scmp.lt.s32.totalorder %s3662_s30, 3 }
  0x12   : > { %s4528_s23 = scalar_select %p3814_p6, 1, 0 }
  0x13   : > { %p530_p9 = pnand %p3019_p7, %p529_p8 }
  0x14   : > { %4529 = sst [smem:[#allocation9_spill]] %s4528_s23  ;;  %s3021_s24 = sshll.u32 (!%p530_p9), %s3793_s0, 1 }
  0x15   : > { %533 = sbr.rel (%p530_p9) target bundleno = 6344 (0x18c8), region = 92  ;;  %p591_p10 = scmp.lt.s32.totalorder (!%p530_p9), %s3021_s24, 3 }
  0x16   : > { %s4530_s20 = sld [smem:[#allocation12_spill]] (!%p530_p9)  ;;  %s3666_s19 = smov (!%p530_p9), 96  }
  0x17   : > { %s4531_s23 = sld [smem:[#allocation10_spill]] (!%p530_p9)  ;;  %s4517_s21 = smov (!%p530_p9), 64  }
  0x18   : > { %s4532_s3 = sld [smem:[#allocation13_spill]] (!%p530_p9)  ;;  %s4513_s29 = smov (!%p530_p9), 112  }
  0x19   : > { %s4511_s1 = smov (!%p530_p9), 48   ;;  %s4535_s22 = smov (!%p530_p9), 112  }
  0x1a   : > { %s4548_s24 = smov (!%p591_p10, %s3021_s24), 3  ;;  %vm627_vm0 = vcmask 261120   ;;  %v703_v34 = vld [vmem:[%s4490_s5 + $0x10] sm:$0xff]  ;;  %v704_v35 = vld [vmem:[%s4490_s5 + $0x18] sm:$0xff]  ;;  %v701_v36 = vld [vmem:[%s4490_s5] sm:$0xff]  ;;  %vm3665_vm1 = vmmov 0  }
  0x1b   : > { %s4510_s25 = sshll.u32 %s4548_s24, 4  ;;  %v708_v37 = vpack.c.bf16 %v704_v35, %v703_v34  ;;  %v702_v38 = vld [vmem:[%s4490_s5 + $0x8] sm:$0xff]  ;;  %v3028_v59 = vld [vmem:[%s4489_s4] ss:$0 sm:$0xff]  ;;  %vm780_vm2 = vcmask 130048   ;;  %s4537_s26 = sshll.u32 %s4548_s24, 4 }
  0x1c   : > { %v610_v0 = vld [vmem:[%s4530_s20] sm:$0xff]  ;;  %v611_v1 = vld [vmem:[%s4530_s20 + $0x8] sm:$0xff]  ;;  %v707_v39 = vpack.c.bf16 %v702_v38, %v701_v36  ;;  %v3667_v38 = vmov -1e+09   ;;  %vm2854_vm5 = vcmask 1041409   ;;  %vm2925_vm6 = vcmask 253952  }
  0x1d   : > { %s595_s27 = scalar_lea.vmem %s4531_s23, %s4510_s25  ;;  %3213 = vmatprep.subr.bf16.mxu1 %v708_v37  ;;  %s4534_s25 = smov 80  }
  0x1e   : > { %v606_v2 = vld [vmem:[%s595_s27] sm:$0xff]  ;;  %v608_v3 = vld [vmem:[%s595_s27 + $0x10] sm:$0xff]  ;;  %v607_v4 = vld [vmem:[%s595_s27 + $0x8] sm:$0xff]  ;;  %3214 = vmatpush3.bf16.msra.mxu1 %v708_v37 }
  0x1f   : > { %v3835_v5 = vadd.f32 %v610_v0, %v606_v2  ;;  %v3837_v6 = vadd.f32 %v610_v0, %v608_v3  ;;  %v3839_v7 = vadd.f32 %v611_v1, %v607_v4  ;;  %v609_v8 = vld [vmem:[%s595_s27 + $0x18] sm:$0xff]  ;;  %3215 = vmatprep.subr.bf16.mxu1 %v707_v39  ;;  %v3027_v54 = vld [vmem:[%s4532_s3] ss:$0 sm:$0xff]  ;;  %s4515_s27 = smov 80  }
  0x20   : > { %v3841_v9 = vadd.f32 %v611_v1, %v609_v8 }
  0x21   : > { %v628_v10 = vsel %vm627_vm0, %v3835_v5, 0.0  ;;  %v634_v11 = vsel %vm627_vm0, %v3837_v6, 0.0  ;;  %v631_v12 = vsel %vm627_vm0, %v3839_v7, 0.0 }
  0x22   : > { %629 = vadd.xlane.f32.xlu0 %v628_v10  ;;  %635 = vadd.xlane.f32.xlu1 %v634_v11  ;;  %v637_v13 = vsel %vm627_vm0, %v3841_v9, 0.0 }
  0x23   : > { %3216 = vmatpush3.bf16.msra.mxu1 %v707_v39 }
  0x26   : > { %632 = vadd.xlane.f32.xlu0 %v631_v12  ;;  %638 = vadd.xlane.f32.xlu1 %v637_v13  ;;  %v3664_v12 = vmov 0.0  }
  0x27   : > { %3227 = vmatprep.subr.bf16.mxu0 %v3664_v12  ;;  %3221 = vmatprep.subr.bf16.mxu1 %v3664_v12 }
  0x28   : > { %3229 = vmatprep.mubr.msk.bf16.mxu0 %vm3665_vm1, %v3664_v12 }
  0xab   : > { %v630_v14 = vpop.xlane.xlu0 %629  ;;  %v636_v15 = vpop.xlane.xlu1 %635 }
  0xac   : > { %v641_v16 = vmul.f32 0.03125, %v630_v14  ;;  %v643_v17 = vmul.f32 0.03125, %v636_v15  ;;  %v3029_v14 = vld [vmem:[%s4491_s6] ss:$0 sm:$0xff] }
  0xae   : > { %v645_v18 = vsub.f32 %v3835_v5, %v641_v16  ;;  %v647_v19 = vsub.f32 %v3837_v6, %v643_v17 }
  0xaf   : > { %v633_v20 = vpop.xlane.xlu0 %632  ;;  %v639_v21 = vpop.xlane.xlu1 %638 }
  0xb0   : > { %v642_v22 = vmul.f32 0.03125, %v633_v20  ;;  %v644_v23 = vmul.f32 0.03125, %v639_v21  ;;  %v649_v24 = vmul.f32 %v645_v18, %v645_v18  ;;  %v651_v25 = vmul.f32 %v647_v19, %v647_v19 }
  0xb2   : > { %v646_v26 = vsub.f32 %v3839_v7, %v642_v22  ;;  %v648_v27 = vsub.f32 %v3841_v9, %v644_v23  ;;  %v653_v28 = vsel %vm627_vm0, %v649_v24, 0.0  ;;  %v659_v29 = vsel %vm627_vm0, %v651_v25, 0.0 }
  0xb3   : > { %654 = vadd.xlane.f32.xlu0 %v653_v28  ;;  %v616_v28 = vlaneseq }
  0xb4   : > { %v650_v30 = vmul.f32 %v646_v26, %v646_v26  ;;  %v652_v31 = vmul.f32 %v648_v27, %v648_v27 }
  0xb6   : > { %v656_v32 = vsel %vm627_vm0, %v650_v30, 0.0  ;;  %v662_v33 = vsel %vm627_vm0, %v652_v31, 0.0  ;;  %v620_v30 = vand.u32 127, %v616_v28 }
  0xb7   : > { %660 = vadd.xlane.f32.xlu0 %v659_v29  ;;  %657 = vadd.xlane.f32.xlu1 %v656_v32  ;;  %v3908_v29 = vshrl.u32 %v616_v28, 7 }
  0xb9   : > { %v618_v31 = vadd.s32 8, %v3908_v29  ;;  %vm621_vm3 = vcmp.le.s32.totalorder %v620_v30, %v3908_v29 }
  0xba   : > { %v3912_v39 = vsel %vm621_vm3, 0.0, %v3667_v38 }
  0xbb   : > { %663 = vadd.xlane.f32.xlu1 %v662_v33  ;;  %vm622_vm4 = vcmp.le.s32.totalorder %v620_v30, %v618_v31 }
 0x13c   : > { %v655_v40 = vpop.xlane.xlu0 %654 }
 0x13d   : > { %v665_v41 = vmul.f32 0.03125, %v655_v40  ;;  %v3914_v40 = vsel %vm622_vm4, 0.0, %v3667_v38 }
 0x13f   : > { %v669_v42 = vadd.f32 1e-05, %v665_v41 }
 0x140   : > { %v658_v43 = vpop.xlane.xlu1 %657  ;;  %v661_v44 = vpop.xlane.xlu0 %660 }
 0x141   : > { %3466 = vrsqrt.f32 %v669_v42  ;;  %v666_v45 = vmul.f32 0.03125, %v658_v43  ;;  %v667_v46 = vmul.f32 0.03125, %v661_v44 }
 0x143   : > { %v670_v47 = vadd.f32 1e-05, %v666_v45  ;;  %v671_v48 = vadd.f32 1e-05, %v667_v46 }
 0x144   : > { %v664_v49 = vpop.xlane.xlu1 %663 }
 0x145   : > { %3468 = vrsqrt.f32 %v670_v47  ;;  %v668_v50 = vmul.f32 0.03125, %v664_v49 }
 0x146   : > { %3470 = vrsqrt.f32 %v671_v48 }
 0x147   : > { %v672_v51 = vadd.f32 1e-05, %v668_v50 }
 0x149   : > { %3472 = vrsqrt.f32 %v672_v51 }
 0x14e   : > { %v3467_v52 = vpop.eup %3466 }
 0x14f   : > { %v677_v53 = vmul.f32 %v3467_v52, %v645_v18 }
 0x151   : > { %v687_v58 = vmul.f32 %v3027_v54, %v677_v53 }
 0x152   : > { %v3469_v55 = vpop.eup %3468 }
 0x153   : > { %v3471_v56 = vpop.eup %3470  ;;  %v678_v57 = vmul.f32 %v3469_v55, %v646_v26  ;;  %v697_v63 = vadd.f32 %v3028_v59, %v687_v58 }
 0x154   : > { %v679_v60 = vmul.f32 %v3471_v56, %v647_v19 }
 0x155   : > { %v688_v61 = vmul.f32 %v3027_v54, %v678_v57 }
 0x156   : > { %v3473_v62 = vpop.eup %3472  ;;  %v689_v2 = vmul.f32 %v3027_v54, %v679_v60 }
 0x157   : > { %v698_v0 = vadd.f32 %v3028_v59, %v688_v61  ;;  %v680_v1 = vmul.f32 %v3473_v62, %v648_v27 }
 0x158   : > { %v699_v8 = vadd.f32 %v3028_v59, %v689_v2 }
 0x159   : > { %v705_v3 = vpack.c.bf16 %v698_v0, %v697_v63  ;;  %v690_v4 = vmul.f32 %v3027_v54, %v680_v1 }
 0x15b   : > { %3217 = vmatprep.mubr.msk.bf16.mxu1 %vm627_vm0, %v705_v3  ;;  %v700_v10 = vadd.f32 %v3028_v59, %v690_v4 }
 0x15d   : > { %v706_v11 = vpack.c.bf16 %v700_v10, %v699_v8 }
 0x15f   : > { %3218 = vmatmul.mubr.msk.bf16.vlgmr.msra.gmra.mxu1 %vm627_vm0, %v706_v11 }
 0x160   : > { %3223 = vmatprep.mubr.msk.bf16.mxu1 %vm3665_vm1, %v3664_v12 }
 0x21f   : > { %v3219_v13 = vpop.f32.mrf.mxu1 }
 0x220   : > { %v765_v17 = vadd.f32 %v3219_v13, %v3029_v14 }
 0x221   : > { %v756_v15 = vpop.f32.mrf.mxu1 }
 0x222   : > { %v757_v20 = vadd.f32 %v3029_v14, %v756_v15 }
 0x223   : > { %v3220_v16 = vpop.f32.mrf.mxu1 }
 0x224   : > { %v768_v18 = vadd.f32 %v3220_v16, %v3029_v14 }
 0x225   : > { %v759_v19 = vpop.f32.mrf.mxu1 }
 0x226   : > { %v3888_v21 = vpack.c.bf16 %v768_v18, %v765_v17  ;;  %v760_v22 = vadd.f32 %v3029_v14, %v759_v19 }
 0x228   : > { %v3890_v23 = vpack.c.bf16 %v760_v22, %v757_v20  ;;  %829 = vrot.lane.b32.xlu1 %v3888_v21, %s3666_s19 }
 0x22a   : > { %778 = vrot.lane.b32.xlu0 %v3890_v23, %s3666_s19 }
 0x29a   : > { %v830_v24 = vpop.permute.xlu1 %829 }
 0x29b   : > { %v835_v25 = vsel %vm780_vm2, %v830_v24, 0 }
 0x29c   : > { %3228 = vmatpush3.bf16.xpose.msra.mxu0 %v835_v25  ;;  %v779_v26 = vpop.permute.xlu0 %778 }
 0x29d   : > { %v785_v27 = vsel %vm780_vm2, %v779_v26, 0  ;;  %3239 = vmatprep.subr.bf16.mxu0 %v3664_v12 }
 0x29e   : > { %3222 = vmatpush3.bf16.xpose.msra.mxu1 %v785_v27 }
 0x29f   : > { %3233 = vmatprep.subr.bf16.mxu1 %v3664_v12 }
 0x2a3   : > { %3230 = vmatmul.mubr.msk.bf16.vlgmr.msra.gmra.mxu0 %vm780_vm2, %v3888_v21 }
 0x2a4   : > { %3241 = vmatprep.mubr.msk.bf16.mxu0 %vm3665_vm1, %v3664_v12 }
 0x2a5   : > { %3224 = vmatmul.mubr.msk.bf16.vlgmr.msra.gmra.mxu1 %vm780_vm2, %v3890_v23 }
 0x2a6   : > { %3235 = vmatprep.mubr.msk.bf16.mxu1 %vm3665_vm1, %v3664_v12 }
 0x363   : > { %v871_v32 = vpop.f32.mrf.mxu0 }
 0x364   : > { %v880_v45 = vmul.f32 0.25, %v871_v32 }
 0x365   : > { %v821_v33 = vpop.f32.mrf.mxu1  ;;  %v3231_v34 = vpop.f32.mrf.mxu0 }
 0x366   : > { %v878_v35 = vmul.f32 0.25, %v821_v33  ;;  %v884_v53 = vadd.f32 %v880_v45, %v3912_v39 }
 0x367   : > { %v3225_v36 = vpop.f32.mrf.mxu1  ;;  %v874_v37 = vpop.f32.mrf.mxu0 }
 0x368   : > { %v881_v41 = vmul.f32 0.25, %v874_v37  ;;  %v882_v42 = vadd.f32 %v878_v35, %v3912_v39  ;;  %v892_v54 = vsel %vm780_vm2, %v884_v53, -inf }
 0x369   : > { %v824_v43 = vpop.f32.mrf.mxu1  ;;  %v3232_v44 = vpop.f32.mrf.mxu0 }
 0x36a   : > { %v879_v46 = vmul.f32 0.25, %v824_v43  ;;  %v886_v47 = vsel %vm780_vm2, %v882_v42, -inf  ;;  %v885_v48 = vadd.f32 %v881_v41, %v3914_v40 }
 0x36b   : > { %887 = vmax.xlane.f32.xlu1 %v886_v47  ;;  %v3226_v49 = vpop.f32.mrf.mxu1 }
 0x36c   : > { %v883_v50 = vadd.f32 %v879_v46, %v3914_v40  ;;  %v895_v51 = vsel %vm780_vm2, %v885_v48, -inf }
 0x36e   : > { %v889_v52 = vsel %vm780_vm2, %v883_v50, -inf }
 0x36f   : > { %896 = vmax.xlane.f32.xlu1 %v895_v51  ;;  %890 = vmax.xlane.f32.xlu0 %v889_v52 }
 0x373   : > { %893 = vmax.xlane.f32.xlu0 %v892_v54 }
 0x380   : > { %979 = vrot.lane.b32.xlu1 %v3888_v21, %s4517_s21 }
 0x384   : > { %1031 = vrot.lane.b32.xlu1 %v3890_v23, %s4515_s27 }
 0x3f4   : > { %v888_v55 = vpop.xlane.xlu1 %887 }
 0x3f5   : > { %v898_v60 = vsub.f32 %v882_v42, %v888_v55 }
 0x3f7   : > { %v902_v2 = vmul.f32 1.442695, %v898_v60 }
 0x3f8   : > { %v897_v56 = vpop.xlane.xlu1 %896  ;;  %v891_v57 = vpop.xlane.xlu0 %890 }
 0x3f9   : > { %v901_v58 = vsub.f32 %v885_v48, %v897_v56  ;;  %v899_v59 = vsub.f32 %v883_v50, %v891_v57 }
 0x3fb   : > { %v908_v61 = vmul.f32 1.442695, %v901_v58  ;;  %v904_v62 = vmul.f32 1.442695, %v899_v59 }
 0x3fc   : > { %v980_v63 = vpop.permute.xlu1 %979  ;;  %v894_v0 = vpop.xlane.xlu0 %893 }
 0x3fd   : > { %3474 = vpow2.f32 %v908_v61  ;;  %v900_v1 = vsub.f32 %v884_v53, %v894_v0  ;;  %3240 = vmatpush3.bf16.msra.mxu0 %v980_v63 }
 0x3fe   : > { %3251 = vmatprep.subr.bf16.mxu0 %v3664_v12  ;;  %3476 = vpow2.f32 %v904_v62 }
 0x3ff   : > { %v906_v3 = vmul.f32 1.442695, %v900_v1 }
 0x400   : > { %v1032_v17 = vpop.permute.xlu1 %1031 }
 0x401   : > { %3478 = vpow2.f32 %v906_v3  ;;  %v1037_v38 = vsel %vm780_vm2, %v1032_v17, 0 }
 0x402   : > { %3480 = vpow2.f32 %v902_v2 }
 0x40a   : > { %v3475_v4 = vpop.eup %3474 }
 0x40b   : > { %v919_v8 = vsel %vm780_vm2, %v3475_v4, 0.0  ;;  %v3477_v10 = vpop.eup %3476 }
 0x40c   : > { %920 = vadd.xlane.f32.xlu1 %v919_v8  ;;  %v913_v13 = vsel %vm780_vm2, %v3477_v10, 0.0 }
 0x40e   : > { %v3479_v11 = vpop.eup %3478 }
 0x40f   : > { %v916_v14 = vsel %vm780_vm2, %v3479_v11, 0.0  ;;  %v3481_v15 = vpop.eup %3480 }
 0x410   : > { %914 = vadd.xlane.f32.xlu1 %v913_v13  ;;  %917 = vadd.xlane.f32.xlu0 %v916_v14  ;;  %v910_v16 = vsel %vm780_vm2, %v3481_v15, 0.0 }
 0x414   : > { %911 = vadd.xlane.f32.xlu0 %v910_v16 }
 0x421   : > { %1082 = vrot.lane.b32.xlu1 %v3888_v21, %s4515_s27  ;;  %s3674_s27 = smov [#allocation2]  }
 0x425   : > { %1080 = vrot.lane.b32.xlu1 %v3888_v21, %s4513_s29 }
 0x42a   : > { %932 = vrot.lane.b32.xlu0 %v3890_v23, %s4517_s21  ;;  %s4536_s21 = smov 48  }
 0x42e   : > { %1029 = vrot.lane.b32.xlu0 %v3890_v23, %s4513_s29  ;;  %s587_s29 = sand.u32 1, %s3654_s28  }
 0x495   : > { %v921_v18 = vpop.xlane.xlu1 %920 }
 0x496   : > { %3482 = vrcp.f32 %v921_v18 }
 0x499   : > { %v915_v19 = vpop.xlane.xlu1 %914  ;;  %v918_v20 = vpop.xlane.xlu0 %917 }
 0x49a   : > { %3484 = vrcp.f32 %v918_v20 }
 0x49b   : > { %3486 = vrcp.f32 %v915_v19 }
 0x49d   : > { %v912_v22 = vpop.xlane.xlu0 %911  ;;  %v1083_v31 = vpop.permute.xlu1 %1082 }
 0x49e   : > { %3488 = vrcp.f32 %v912_v22  ;;  %v1088_v36 = vsel %vm780_vm2, %v1083_v31, 0 }
 0x4a1   : > { %v933_v24 = vpop.permute.xlu0 %932  ;;  %v1081_v41 = vpop.permute.xlu1 %1080 }
 0x4a2   : > { %3234 = vmatpush3.bf16.msra.mxu1 %v933_v24 }
 0x4a3   : > { %3245 = vmatprep.subr.bf16.mxu1 %v3664_v12  ;;  %v3483_v25 = vpop.eup %3482 }
 0x4a4   : > { %v929_v30 = vmul.f32 %v3483_v25, %v3475_v4 }
 0x4a5   : > { %v1030_v42 = vpop.permute.xlu0 %1029 }
 0x4a7   : > { %v3485_v26 = vpop.eup %3484 }
 0x4a8   : > { %v3487_v27 = vpop.eup %3486  ;;  %v928_v28 = vmul.f32 %v3485_v26, %v3479_v11 }
 0x4a9   : > { %v927_v35 = vmul.f32 %v3487_v27, %v3477_v10 }
 0x4aa   : > { %v931_v33 = vpack.c.bf16 %v929_v30, %v928_v28 }
 0x4ab   : > { %v3489_v32 = vpop.eup %3488 }
 0x4ac   : > { %v926_v34 = vmul.f32 %v3489_v32, %v3481_v15  ;;  %3242 = vmatmul.mubr.msk.bf16.vlgmr.msra.gmra.mxu0 %vm780_vm2, %v931_v33 }
 0x4ad   : > { %3252 = vmatpush3.bf16.xpose.msra.mxu0 %v1088_v36  ;;  %3253 = vmatprep.mubr.msk.bf16.mxu0 %vm3665_vm1, %v3664_v12 }
 0x4ae   : > { %v930_v37 = vpack.c.bf16 %v927_v35, %v926_v34  ;;  %3263 = vmatprep.subr.bf16.mxu0 %v3664_v12 }
 0x4b0   : > { %3236 = vmatmul.mubr.msk.bf16.vlgmr.msra.gmra.mxu1 %vm780_vm2, %v930_v37 }
 0x4b1   : > { %3246 = vmatpush3.bf16.xpose.msra.mxu1 %v1037_v38  ;;  %3247 = vmatprep.mubr.msk.bf16.mxu1 %vm3665_vm1, %v3664_v12 }
 0x4b2   : > { %3257 = vmatprep.subr.bf16.mxu1 %v3664_v12 }
 0x4b4   : > { %3254 = vmatmul.mubr.msk.bf16.vlgmr.msra.gmra.mxu0 %vm780_vm2, %v1081_v41 }
 0x4b5   : > { %3265 = vmatprep.mubr.msk.bf16.mxu0 %vm3665_vm1, %v3664_v12 }
 0x4b8   : > { %3248 = vmatmul.mubr.msk.bf16.vlgmr.msra.gmra.mxu1 %vm780_vm2, %v1030_v42  ;;  %v771_v42 = vld [vmem:[%s4492_s7] sm:$0xff] }
 0x4b9   : > { %3259 = vmatprep.mubr.msk.bf16.mxu1 %vm3665_vm1, %v3664_v12 }
 0x56c   : > { %v3958_v43 = vpop.f32.mrf.mxu0 }
 0x56e   : > { %v3243_v44 = vpop.f32.mrf.mxu0 }
 0x56f   : > { %v772_v44 = vld [vmem:[%s4492_s7 + $0x8] sm:$0xff] }
 0x570   : > { %v3960_v45 = vpop.f32.mrf.mxu1  ;;  %v3962_v46 = vpop.f32.mrf.mxu0 }
 0x571   : > { %v1027_v47 = vpack.c.bf16 %v3962_v46, %v3958_v43 }
 0x572   : > { %v3237_v48 = vpop.f32.mrf.mxu1  ;;  %v3244_v49 = vpop.f32.mrf.mxu0 }
 0x574   : > { %v3966_v50 = vpop.f32.mrf.mxu1  ;;  %v1124_v52 = vpop.f32.mrf.mxu0 }
 0x575   : > { %v1026_v51 = vpack.c.bf16 %v3966_v50, %v3960_v45  ;;  %v1133_v56 = vmul.f32 0.25, %v1124_v52 }
 0x576   : > { %v3238_v53 = vpop.f32.mrf.mxu1  ;;  %v3255_v54 = vpop.f32.mrf.mxu0 }
 0x577   : > { %v1137_v2 = vadd.f32 %v1133_v56, %v3912_v39 }
 0x578   : > { %v1073_v55 = vpop.f32.mrf.mxu1  ;;  %v1127_v58 = vpop.f32.mrf.mxu0 }
 0x579   : > { %v1131_v57 = vmul.f32 0.25, %v1073_v55  ;;  %v1134_v63 = vmul.f32 0.25, %v1127_v58  ;;  %v1145_v8 = vsel %vm780_vm2, %v1137_v2, -inf }
 0x57a   : > { %v3249_v59 = vpop.f32.mrf.mxu1  ;;  %v3256_v60 = vpop.f32.mrf.mxu0 }
 0x57b   : > { %v1135_v61 = vadd.f32 %v1131_v57, %v3912_v39  ;;  %v1138_v11 = vadd.f32 %v1134_v63, %v3914_v40  ;;  %v774_v63 = vld [vmem:[%s4492_s7 + $0x18] sm:$0xff] }
 0x57c   : > { %v1076_v62 = vpop.f32.mrf.mxu1 }
 0x57d   : > { %v1132_v0 = vmul.f32 0.25, %v1076_v62  ;;  %v1139_v1 = vsel %vm780_vm2, %v1135_v61, -inf  ;;  %v1148_v13 = vsel %vm780_vm2, %v1138_v11, -inf  ;;  %v773_v62 = vld [vmem:[%s4492_s7 + $0x10] sm:$0xff] }
 0x57e   : > { %1140 = vmax.xlane.f32.xlu0 %v1139_v1  ;;  %v3250_v3 = vpop.f32.mrf.mxu1  ;;  %v1281_v45 = vpack.c.bf16 %v774_v63, %v773_v62  ;;  %v1481_v63 = vld [vmem:[%s4496_s11] sm:$0xff] }
 0x57f   : > { %v1136_v4 = vadd.f32 %v1132_v0, %v3914_v40 }
 0x581   : > { %v1142_v10 = vsel %vm780_vm2, %v1136_v4, -inf }
 0x582   : > { %1146 = vmax.xlane.f32.xlu0 %v1145_v8  ;;  %1143 = vmax.xlane.f32.xlu1 %v1142_v10 }
 0x586   : > { %1149 = vmax.xlane.f32.xlu0 %v1148_v13 }
 0x607   : > { %v1141_v14 = vpop.xlane.xlu0 %1140 }
 0x608   : > { %v1151_v15 = vsub.f32 %v1135_v61, %v1141_v14 }
 0x60a   : > { %v1155_v19 = vmul.f32 1.442695, %v1151_v15 }
 0x60b   : > { %v1147_v16 = vpop.xlane.xlu0 %1146  ;;  %v1144_v17 = vpop.xlane.xlu1 %1143 }
 0x60c   : > { %v1153_v18 = vsub.f32 %v1137_v2, %v1147_v16  ;;  %v1152_v22 = vsub.f32 %v1136_v4, %v1144_v17  ;;  %v3044_v16 = vld [vmem:[%s4493_s8] ss:$0 sm:$0xff] }
 0x60e   : > { %v1159_v20 = vmul.f32 1.442695, %v1153_v18  ;;  %v1157_v26 = vmul.f32 1.442695, %v1152_v22 }
 0x60f   : > { %v1150_v24 = vpop.xlane.xlu0 %1149 }
 0x610   : > { %3490 = vpow2.f32 %v1159_v20  ;;  %v1154_v25 = vsub.f32 %v1138_v11, %v1150_v24 }
 0x611   : > { %3492 = vpow2.f32 %v1155_v19 }
 0x612   : > { %v1161_v27 = vmul.f32 1.442695, %v1154_v25 }
 0x614   : > { %3494 = vpow2.f32 %v1161_v27 }
 0x615   : > { %3496 = vpow2.f32 %v1157_v26 }
 0x61d   : > { %v3491_v28 = vpop.eup %3490 }
 0x61e   : > { %v1169_v30 = vsel %vm780_vm2, %v3491_v28, 0.0  ;;  %v3493_v31 = vpop.eup %3492 }
 0x61f   : > { %1170 = vadd.xlane.f32.xlu0 %v1169_v30  ;;  %v1163_v33 = vsel %vm780_vm2, %v3493_v31, 0.0 }
 0x621   : > { %v3495_v32 = vpop.eup %3494 }
 0x622   : > { %v1172_v34 = vsel %vm780_vm2, %v3495_v32, 0.0  ;;  %v3497_v35 = vpop.eup %3496 }
 0x623   : > { %1164 = vadd.xlane.f32.xlu0 %v1163_v33  ;;  %1173 = vadd.xlane.f32.xlu1 %v1172_v34  ;;  %v1166_v36 = vsel %vm780_vm2, %v3497_v35, 0.0 }
 0x627   : > { %1167 = vadd.xlane.f32.xlu1 %v1166_v36 }
 0x638   : > { %1232 = vrot.lane.b32.xlu1 %v3888_v21, %s4511_s1  ;;  %v1028_v21 = vpack.c.bf16 %v772_v44, %v771_v42 }
 0x639   : > { %1185 = vrot.lane.b32.xlu0 %v3890_v23, %s4511_s1  ;;  %s3020_s1 = sshll.u32 %s587_s29, 1 }
 0x63a   : > { %s589_s23 = scalar_lea.vmem [#allocation2], %s3020_s1  ;;  %s3606_s1 = sshll.u32 %s3674_s27, 4  ;;  %s3607_s1 = int_to_ptr.vmem [resolvable:$false] %s3606_s1 }
 0x6a8   : > { %v1171_v37 = vpop.xlane.xlu0 %1170 }
 0x6a9   : > { %3498 = vrcp.f32 %v1171_v37 }
 0x6ac   : > { %v1165_v38 = vpop.xlane.xlu0 %1164  ;;  %v1174_v41 = vpop.xlane.xlu1 %1173 }
 0x6ad   : > { %3500 = vrcp.f32 %v1174_v41 }
 0x6ae   : > { %3502 = vrcp.f32 %v1165_v38 }
 0x6b0   : > { %v1186_v48 = vpop.permute.xlu0 %1185  ;;  %v1168_v49 = vpop.xlane.xlu1 %1167 }
 0x6b1   : > { %3504 = vrcp.f32 %v1168_v49  ;;  %3258 = vmatpush3.bf16.msra.mxu1 %v1186_v48 }
 0x6b2   : > { %3269 = vmatprep.subr.bf16.mxu1 %v1281_v45 }
 0x6b4   : > { %v1233_v23 = vpop.permute.xlu1 %1232 }
 0x6b5   : > { %3264 = vmatpush3.bf16.msra.mxu0 %v1233_v23 }
 0x6b6   : > { %3275 = vmatprep.subr.bf16.mxu0 %v1028_v21  ;;  %v3499_v52 = vpop.eup %3498 }
 0x6b7   : > { %v1181_v55 = vmul.f32 %v3499_v52, %v3491_v28 }
 0x6ba   : > { %v3501_v53 = vpop.eup %3500 }
 0x6bb   : > { %v3503_v54 = vpop.eup %3502  ;;  %v1182_v56 = vmul.f32 %v3501_v53, %v3495_v32 }
 0x6bc   : > { %v1179_v59 = vmul.f32 %v3503_v54, %v3493_v31 }
 0x6bd   : > { %v1184_v58 = vpack.c.bf16 %v1182_v56, %v1181_v55 }
 0x6be   : > { %v3505_v57 = vpop.eup %3504 }
 0x6bf   : > { %v1180_v60 = vmul.f32 %v3505_v57, %v3497_v35  ;;  %3266 = vmatmul.mubr.msk.bf16.vlgmr.msra.gmra.mxu0 %vm780_vm2, %v1184_v58 }
 0x6c0   : > { %3277 = vmatprep.mubr.msk.bf16.mxu0 %vm780_vm2, %v1026_v51  ;;  %3276 = vmatpush3.bf16.msra.mxu0 %v1028_v21 }
 0x6c1   : > { %v1183_v61 = vpack.c.bf16 %v1180_v60, %v1179_v59  ;;  %v1483_v60 = vld [vmem:[%s4496_s11 + $0x10] sm:$0xff] }
 0x6c3   : > { %3260 = vmatmul.mubr.msk.bf16.vlgmr.msra.gmra.mxu1 %vm780_vm2, %v1183_v61  ;;  %v1484_v61 = vld [vmem:[%s4496_s11 + $0x18] sm:$0xff] }
 0x6c4   : > { %3270 = vmatpush3.bf16.msra.mxu1 %v1281_v45  ;;  %v1488_v62 = vpack.c.bf16 %v1484_v61, %v1483_v60  ;;  %v1482_v45 = vld [vmem:[%s4496_s11 + $0x8] sm:$0xff]  ;;  %v1585_v60 = vld [vmem:[%s4498_s13 + $0x10] sm:$0xff]  ;;  %v1586_v61 = vld [vmem:[%s4498_s13 + $0x18] sm:$0xff] }
 0x6c6   : > { %3281 = vmatprep.subr.bf16.mxu1 %v1488_v62 }
 0x6c7   : > { %3278 = vmatmul.mubr.msk.bf16.vlgmr.msra.gmra.mxu0 %vm780_vm2, %v1027_v47 }
 0x77f   : > { %v1272_v50 = vpop.f32.mrf.mxu0 }
 0x781   : > { %v3267_v51 = vpop.f32.mrf.mxu0 }
 0x783   : > { %v1225_v0 = vpop.f32.mrf.mxu1  ;;  %v1275_v1 = vpop.f32.mrf.mxu0 }
 0x784   : > { %v1280_v47 = vpack.c.bf16 %v1275_v1, %v1272_v50  ;;  %v1487_v50 = vpack.c.bf16 %v1482_v45, %v1481_v63  ;;  %v1583_v63 = vld [vmem:[%s4498_s13] sm:$0xff]  ;;  %v1584_v45 = vld [vmem:[%s4498_s13 + $0x8] sm:$0xff] }
 0x785   : > { %v3261_v2 = vpop.f32.mrf.mxu1  ;;  %v3268_v3 = vpop.f32.mrf.mxu0 }
 0x787   : > { %v1228_v43 = vpop.f32.mrf.mxu1  ;;  %v3279_v8 = vpop.f32.mrf.mxu0 }
 0x788   : > { %v1279_v46 = vpack.c.bf16 %v1228_v43, %v1225_v0 }
 0x789   : > { %v3262_v4 = vpop.f32.mrf.mxu1  ;;  %v1377_v10 = vpop.f32.mrf.mxu0 }
 0x78a   : > { %3271 = vmatprep.mubr.msk.bf16.mxu1 %vm780_vm2, %v1279_v46 }
 0x78b   : > { %3272 = vmatmul.mubr.msk.bf16.vlgmr.msra.gmra.mxu1 %vm780_vm2, %v1280_v47  ;;  %v3280_v13 = vpop.f32.mrf.mxu0 }
 0x78c   : > { %3282 = vmatpush3.bf16.msra.mxu1 %v1488_v62  ;;  %v1602_v62 = vpack.c.bf16 %v1586_v61, %v1585_v60 }
 0x78d   : > { %v1380_v22 = vpop.f32.mrf.mxu0  ;;  %3283 = vmatprep.subr.bf16.mxu1 %v1487_v50 }
 0x790   : > { %3284 = vmatpush3.bf16.msra.mxu1 %v1487_v50  ;;  %v1601_v50 = vpack.c.bf16 %v1584_v45, %v1583_v63 }
 0x84b   : > { %v3273_v11 = vpop.f32.mrf.mxu1 }
 0x84c   : > { %v1386_v18 = vadd.f32 %v3279_v8, %v3273_v11 }
 0x84d   : > { %v1322_v14 = vpop.f32.mrf.mxu1 }
 0x84e   : > { %v1378_v15 = vadd.f32 %v1377_v10, %v1322_v14  ;;  %v1401_v28 = vadd.f32 %v3044_v16, %v1386_v18 }
 0x84f   : > { %v3274_v17 = vpop.f32.mrf.mxu1 }
 0x850   : > { %v1399_v19 = vadd.f32 %v3044_v16, %v1378_v15  ;;  %v1389_v20 = vadd.f32 %v3280_v13, %v3274_v17  ;;  %v4025_v34 = vadd.f32 %v1401_v28, %v3837_v6  ;;  %v3045_v15 = vld [vmem:[%s4494_s9] ss:$0 sm:$0xff] }
 0x851   : > { %v1325_v24 = vpop.f32.mrf.mxu1 }
 0x852   : > { %v4014_v25 = vadd.f32 %v1399_v19, %v3835_v5  ;;  %v1402_v26 = vadd.f32 %v3044_v16, %v1389_v20  ;;  %v1381_v27 = vadd.f32 %v1380_v22, %v1325_v24  ;;  %v3046_v19 = vld [vmem:[%s4495_s10] ss:$0 sm:$0xff] }
 0x854   : > { %v4017_v30 = vadd.f32 %v1402_v26, %v3841_v9  ;;  %v1400_v31 = vadd.f32 %v3044_v16, %v1381_v27  ;;  %v1409_v32 = vsel %vm627_vm0, %v4014_v25, 0.0  ;;  %v1415_v9 = vsel %vm627_vm0, %v4025_v34, 0.0 }
 0x855   : > { %1410 = vadd.xlane.f32.xlu1 %v1409_v32 }
 0x856   : > { %v4022_v33 = vadd.f32 %v1400_v31, %v3839_v7  ;;  %v1418_v5 = vsel %vm627_vm0, %v4017_v30, 0.0 }
 0x858   : > { %v1412_v35 = vsel %vm627_vm0, %v4022_v33, 0.0 }
 0x859   : > { %1419 = vadd.xlane.f32.xlu1 %v1418_v5  ;;  %1413 = vadd.xlane.f32.xlu0 %v1412_v35 }
 0x85d   : > { %1416 = vadd.xlane.f32.xlu0 %v1415_v9 }
 0x8de   : > { %v1411_v36 = vpop.xlane.xlu1 %1410 }
 0x8df   : > { %v1421_v37 = vmul.f32 0.03125, %v1411_v36 }
 0x8e1   : > { %v1425_v7 = vsub.f32 %v4014_v25, %v1421_v37 }
 0x8e2   : > { %v1420_v38 = vpop.xlane.xlu1 %1419  ;;  %v1414_v41 = vpop.xlane.xlu0 %1413 }
 0x8e3   : > { %v1424_v6 = vmul.f32 0.03125, %v1420_v38  ;;  %v1422_v42 = vmul.f32 0.03125, %v1414_v41  ;;  %v1429_v44 = vmul.f32 %v1425_v7, %v1425_v7  ;;  %v1598_v38 = vld [vmem:[%s4498_s13 + $0x78] sm:$0xff] }
 0x8e5   : > { %v1428_v48 = vsub.f32 %v4017_v30, %v1424_v6  ;;  %v1426_v49 = vsub.f32 %v4022_v33, %v1422_v42  ;;  %v1433_v21 = vsel %vm627_vm0, %v1429_v44, 0.0  ;;  %v1595_v6 = vld [vmem:[%s4498_s13 + $0x60] sm:$0xff]  ;;  %v1596_v42 = vld [vmem:[%s4498_s13 + $0x68] sm:$0xff] }
 0x8e6   : > { %1434 = vadd.xlane.f32.xlu0 %v1433_v21  ;;  %v1417_v23 = vpop.xlane.xlu0 %1416  ;;  %v1607_v44 = vpack.c.bf16 %v1596_v42, %v1595_v6  ;;  %v3054_v42 = vld [vmem:[%s4499_s14] ss:$0 sm:$0xff] }
 0x8e7   : > { %v1423_v52 = vmul.f32 0.03125, %v1417_v23  ;;  %v1430_v53 = vmul.f32 %v1426_v49, %v1426_v49  ;;  %v1432_v56 = vmul.f32 %v1428_v48, %v1428_v48  ;;  %v1591_v23 = vld [vmem:[%s4498_s13 + $0x40] sm:$0xff] }
 0x8e9   : > { %v1427_v54 = vsub.f32 %v4025_v34, %v1423_v52  ;;  %v1436_v55 = vsel %vm627_vm0, %v1430_v53, 0.0  ;;  %v1442_v58 = vsel %vm627_vm0, %v1432_v56, 0.0  ;;  %v1592_v52 = vld [vmem:[%s4498_s13 + $0x48] sm:$0xff] }
 0x8ea   : > { %1437 = vadd.xlane.f32.xlu1 %v1436_v55  ;;  %v1605_v53 = vpack.c.bf16 %v1592_v52, %v1591_v23  ;;  %v1590_v55 = vld [vmem:[%s4498_s13 + $0x38] sm:$0xff] }
 0x8eb   : > { %v1431_v57 = vmul.f32 %v1427_v54, %v1427_v54 }
 0x8ed   : > { %v1439_v59 = vsel %vm627_vm0, %v1431_v57, 0.0  ;;  %v1587_v57 = vld [vmem:[%s4498_s13 + $0x20] sm:$0xff] }
 0x8ee   : > { %1443 = vadd.xlane.f32.xlu1 %v1442_v58  ;;  %1440 = vadd.xlane.f32.xlu0 %v1439_v59  ;;  %v1588_v58 = vld [vmem:[%s4498_s13 + $0x28] sm:$0xff] }
 0x8ef   : > { %v1603_v59 = vpack.c.bf16 %v1588_v58, %v1587_v57 }
 0x96f   : > { %v1435_v51 = vpop.xlane.xlu0 %1434 }
 0x970   : > { %v1445_v0 = vmul.f32 0.03125, %v1435_v51  ;;  %v3047_v51 = vld [vmem:[%s4497_s12] ss:$0 sm:$0xff] }
 0x972   : > { %v1449_v1 = vadd.f32 1e-05, %v1445_v0 }
 0x973   : > { %v1438_v2 = vpop.xlane.xlu1 %1437 }
 0x974   : > { %3506 = vrsqrt.f32 %v1449_v1  ;;  %v1446_v3 = vmul.f32 0.03125, %v1438_v2 }
 0x976   : > { %v1450_v43 = vadd.f32 1e-05, %v1446_v3 }
 0x977   : > { %v1444_v46 = vpop.xlane.xlu1 %1443  ;;  %v1441_v47 = vpop.xlane.xlu0 %1440 }
 0x978   : > { %3508 = vrsqrt.f32 %v1450_v43  ;;  %v1448_v4 = vmul.f32 0.03125, %v1444_v46  ;;  %v1447_v8 = vmul.f32 0.03125, %v1441_v47 }
 0x97a   : > { %v1452_v10 = vadd.f32 1e-05, %v1448_v4  ;;  %v1451_v11 = vadd.f32 1e-05, %v1447_v8 }
 0x97c   : > { %3510 = vrsqrt.f32 %v1452_v10 }
 0x97d   : > { %3512 = vrsqrt.f32 %v1451_v11 }
 0x981   : > { %v3507_v13 = vpop.eup %3506 }
 0x982   : > { %v1457_v14 = vmul.f32 %v3507_v13, %v1425_v7  ;;  %v1597_v7 = vld [vmem:[%s4498_s13 + $0x70] sm:$0xff] }
 0x983   : > { %v1608_v41 = vpack.c.bf16 %v1598_v38, %v1597_v7 }
 0x984   : > { %v1467_v18 = vmul.f32 %v3045_v15, %v1457_v14 }
 0x985   : > { %v3509_v16 = vpop.eup %3508  ;;  %3289 = vmatprep.subr.bf16.mxu0 %v1608_v41 }
 0x986   : > { %v1458_v17 = vmul.f32 %v3509_v16, %v1426_v49  ;;  %v1477_v27 = vadd.f32 %v3046_v19, %v1467_v18  ;;  %3290 = vmatpush3.bf16.msra.mxu0 %v1608_v41  ;;  %v1594_v49 = vld [vmem:[%s4498_s13 + $0x58] sm:$0xff] }
 0x987   : > { %3291 = vmatprep.subr.bf16.mxu0 %v1607_v44 }
 0x988   : > { %v1468_v20 = vmul.f32 %v3045_v15, %v1458_v17 }
 0x989   : > { %v3511_v22 = vpop.eup %3510 }
 0x98a   : > { %v3513_v24 = vpop.eup %3512  ;;  %v1460_v26 = vmul.f32 %v3511_v22, %v1428_v48  ;;  %v1478_v28 = vadd.f32 %v3046_v19, %v1468_v20  ;;  %3292 = vmatpush3.bf16.msra.mxu0 %v1607_v44  ;;  %v1593_v48 = vld [vmem:[%s4498_s13 + $0x50] sm:$0xff] }
 0x98b   : > { %v1459_v31 = vmul.f32 %v3513_v24, %v1427_v54  ;;  %v1606_v21 = vpack.c.bf16 %v1594_v49, %v1593_v48  ;;  %v1589_v54 = vld [vmem:[%s4498_s13 + $0x30] sm:$0xff] }
 0x98c   : > { %v1485_v32 = vpack.c.bf16 %v1478_v28, %v1477_v27  ;;  %v1470_v5 = vmul.f32 %v3045_v15, %v1460_v26  ;;  %v1604_v56 = vpack.c.bf16 %v1590_v55, %v1589_v54 }
 0x98d   : > { %v1469_v35 = vmul.f32 %v3045_v15, %v1459_v31  ;;  %3293 = vmatprep.subr.bf16.mxu0 %v1606_v21 }
 0x98e   : > { %3285 = vmatprep.mubr.msk.bf16.mxu1 %vm627_vm0, %v1485_v32  ;;  %v1480_v9 = vadd.f32 %v3046_v19, %v1470_v5  ;;  %3294 = vmatpush3.bf16.msra.mxu0 %v1606_v21 }
 0x98f   : > { %v1479_v36 = vadd.f32 %v3046_v19, %v1469_v35  ;;  %3295 = vmatprep.subr.bf16.mxu0 %v1605_v53 }
 0x991   : > { %v1486_v37 = vpack.c.bf16 %v1480_v9, %v1479_v36 }
 0x992   : > { %3296 = vmatpush3.bf16.msra.mxu0 %v1605_v53 }
 0x993   : > { %3286 = vmatmul.mubr.msk.bf16.vlgmr.msra.gmra.mxu1 %vm627_vm0, %v1486_v37  ;;  %3297 = vmatprep.subr.bf16.mxu0 %v1604_v56 }
 0x996   : > { %3298 = vmatpush3.bf16.msra.mxu0 %v1604_v56 }
 0x997   : > { %3299 = vmatprep.subr.bf16.mxu0 %v1603_v59 }
 0x99a   : > { %3300 = vmatpush3.bf16.msra.mxu0 %v1603_v59 }
 0x99b   : > { %3301 = vmatprep.subr.bf16.mxu0 %v1602_v62 }
 0x99e   : > { %3302 = vmatpush3.bf16.msra.mxu0 %v1602_v62 }
 0x99f   : > { %3303 = vmatprep.subr.bf16.mxu0 %v1601_v50 }
 0x9a2   : > { %3304 = vmatpush3.bf16.msra.mxu0 %v1601_v50 }
 0x9a3   : > { %3335 = vmatprep.subr.bf16.mxu0 %v3664_v12 }
 0xa53   : > { %v3287_v0 = vpop.f32.mrf.mxu1 }
 0xa54   : > { %v1545_v1 = vadd.f32 %v3287_v0, %v3047_v51 }
 0xa55   : > { %v1536_v2 = vpop.f32.mrf.mxu1 }
 0xa56   : > { %v3052_v3 = vmul.f32 -1.702, %v1545_v1  ;;  %v1537_v43 = vadd.f32 %v3047_v51, %v1536_v2 }
 0xa57   : > { %v3288_v46 = vpop.f32.mrf.mxu1 }
 0xa58   : > { %v1563_v47 = vmul.f32 1.442695, %v3052_v3  ;;  %v3050_v4 = vmul.f32 -1.702, %v1537_v43  ;;  %v1548_v8 = vadd.f32 %v3288_v46, %v3047_v51 }
 0xa59   : > { %v1539_v10 = vpop.f32.mrf.mxu1 }
 0xa5a   : > { %v1559_v11 = vmul.f32 1.442695, %v3050_v4  ;;  %v3053_v13 = vmul.f32 -1.702, %v1548_v8  ;;  %v1540_v14 = vadd.f32 %v3047_v51, %v1539_v10  ;;  %3514 = vpow2.f32 %v1563_v47 }
 0xa5c   : > { %3516 = vpow2.f32 %v1559_v11  ;;  %v1565_v15 = vmul.f32 1.442695, %v3053_v13  ;;  %v3051_v16 = vmul.f32 -1.702, %v1540_v14  ;;  %v3061_v13 = vld [vmem:[%s4490_s5 + $0x30] sm:$0xff] }
 0xa5e   : > { %3518 = vpow2.f32 %v1565_v15  ;;  %v1561_v17 = vmul.f32 1.442695, %v3051_v16  ;;  %v3059_v16 = vld [vmem:[%s4490_s5 + $0x20] sm:$0xff] }
 0xa60   : > { %3520 = vpow2.f32 %v1561_v17  ;;  %v3060_v17 = vld [vmem:[%s4490_s5 + $0x28] sm:$0xff] }
 0xa67   : > { %v3515_v18 = vpop.eup %3514 }
 0xa68   : > { %v1569_v24 = vadd.f32 1.0, %v3515_v18  ;;  %v1752_v18 = vpack.c.bf16 %v3060_v17, %v3059_v16 }
 0xa69   : > { %v3517_v19 = vpop.eup %3516 }
 0xa6a   : > { %v1567_v20 = vadd.f32 1.0, %v3517_v19 }
 0xa6b   : > { %v3519_v22 = vpop.eup %3518 }
 0xa6c   : > { %v1570_v26 = vadd.f32 1.0, %v3519_v22  ;;  %3522 = vrcp.f32 %v1567_v20 }
 0xa6d   : > { %v3521_v27 = vpop.eup %3520 }
 0xa6e   : > { %3524 = vrcp.f32 %v1570_v26  ;;  %v1568_v28 = vadd.f32 1.0, %v3521_v27 }
 0xa6f   : > { %3526 = vrcp.f32 %v1569_v24 }
 0xa70   : > { %3528 = vrcp.f32 %v1568_v28 }
 0xa79   : > { %v3523_v31 = vpop.eup %3522 }
 0xa7a   : > { %v1579_v36 = vmul.f32 %v3523_v31, %v1537_v43 }
 0xa7b   : > { %v3525_v32 = vpop.eup %3524 }
 0xa7c   : > { %v3527_v5 = vpop.eup %3526  ;;  %v1582_v9 = vmul.f32 %v3525_v32, %v1548_v8 }
 0xa7d   : > { %v3529_v35 = vpop.eup %3528  ;;  %v1581_v7 = vmul.f32 %v3527_v5, %v1545_v1 }
 0xa7e   : > { %v1580_v37 = vmul.f32 %v3529_v35, %v1540_v14  ;;  %v3062_v14 = vld [vmem:[%s4490_s5 + $0x38] sm:$0xff] }
 0xa7f   : > { %v1600_v41 = vpack.c.bf16 %v1582_v9, %v1581_v7  ;;  %v1753_v15 = vpack.c.bf16 %v3062_v14, %v3061_v13  ;;  %v3057_v7 = vld [vmem:[%s4532_s3 + $0x1] ss:$0 sm:$0xff] }
 0xa80   : > { %v1599_v38 = vpack.c.bf16 %v1580_v37, %v1579_v36 }
 0xa81   : > { %3309 = vmatprep.subr.bf16.mxu1 %v1753_v15 }
 0xa82   : > { %3305 = vmatprep.mubr.bf16.mxu0 %v1599_v38  ;;  %3310 = vmatpush3.bf16.msra.mxu1 %v1753_v15 }
 0xa83   : > { %3306 = vmatmul.mubr.bf16.vlgmr.msra.gmra.mxu0 %v1600_v41  ;;  %3311 = vmatprep.subr.bf16.mxu1 %v1752_v18 }
 0xa84   : > { %3337 = vmatprep.mubr.msk.bf16.mxu0 %vm3665_vm1, %v3664_v12 }
 0xa86   : > { %3312 = vmatpush3.bf16.msra.mxu1 %v1752_v18 }
 0xa87   : > { %3317 = vmatprep.subr.bf16.mxu1 %v3664_v12 }
 0xb43   : > { %v3307_v6 = vpop.f32.mrf.mxu0 }
 0xb44   : > { %v1659_v48 = vadd.f32 %v3307_v6, %v3054_v42 }
 0xb45   : > { %v1650_v44 = vpop.f32.mrf.mxu0 }
 0xb46   : > { %v1651_v49 = vadd.f32 %v3054_v42, %v1650_v44  ;;  %v4122_v53 = vadd.f32 %v1659_v48, %v4025_v34  ;;  %v3058_v48 = vld [vmem:[%s4489_s4 + $0x1] ss:$0 sm:$0xff] }
 0xb47   : > { %v3308_v21 = vpop.f32.mrf.mxu0 }
 0xb48   : > { %v4119_v23 = vadd.f32 %v1651_v49, %v4014_v25  ;;  %v1662_v54 = vadd.f32 %v3308_v21, %v3054_v42  ;;  %v1679_v59 = vsel %vm627_vm0, %v4122_v53, 0.0 }
 0xb49   : > { %v1653_v52 = vpop.f32.mrf.mxu0 }
 0xb4a   : > { %v1654_v55 = vadd.f32 %v3054_v42, %v1653_v52  ;;  %v1673_v56 = vsel %vm627_vm0, %v4119_v23, 0.0  ;;  %v4130_v58 = vadd.f32 %v1662_v54, %v4017_v30 }
 0xb4b   : > { %1674 = vadd.xlane.f32.xlu0 %v1673_v56 }
 0xb4c   : > { %v4127_v57 = vadd.f32 %v1654_v55, %v4022_v33  ;;  %v1682_v34 = vsel %vm627_vm0, %v4130_v58, 0.0 }
 0xb4e   : > { %v1676_v25 = vsel %vm627_vm0, %v4127_v57, 0.0 }
 0xb4f   : > { %1677 = vadd.xlane.f32.xlu1 %v1676_v25  ;;  %1680 = vadd.xlane.f32.xlu0 %v1679_v59 }
 0xb53   : > { %1683 = vadd.xlane.f32.xlu1 %v1682_v34 }
 0xbd4   : > { %v1675_v60 = vpop.xlane.xlu0 %1674 }
 0xbd5   : > { %v1685_v61 = vmul.f32 0.03125, %v1675_v60 }
 0xbd7   : > { %v1689_v33 = vsub.f32 %v4119_v23, %v1685_v61 }
 0xbd8   : > { %v1678_v62 = vpop.xlane.xlu1 %1677  ;;  %v1681_v63 = vpop.xlane.xlu0 %1680 }
 0xbd9   : > { %v1686_v30 = vmul.f32 0.03125, %v1678_v62  ;;  %v1687_v45 = vmul.f32 0.03125, %v1681_v63  ;;  %v1693_v50 = vmul.f32 %v1689_v33, %v1689_v33  ;;  %v3064_v62 = vld [vmem:[%s4491_s6 + $0x1] ss:$0 sm:$0xff] }
 0xbdb   : > { %v1690_v51 = vsub.f32 %v4127_v57, %v1686_v30  ;;  %v1691_v0 = vsub.f32 %v4122_v53, %v1687_v45  ;;  %v1697_v1 = vsel %vm627_vm0, %v1693_v50, 0.0 }
 0xbdc   : > { %v1684_v2 = vpop.xlane.xlu1 %1683  ;;  %1698 = vadd.xlane.f32.xlu0 %v1697_v1 }
 0xbdd   : > { %v1688_v3 = vmul.f32 0.03125, %v1684_v2  ;;  %v1694_v43 = vmul.f32 %v1690_v51, %v1690_v51  ;;  %v1695_v46 = vmul.f32 %v1691_v0, %v1691_v0 }
 0xbdf   : > { %v1692_v47 = vsub.f32 %v4130_v58, %v1688_v3  ;;  %v1700_v4 = vsel %vm627_vm0, %v1694_v43, 0.0  ;;  %v1703_v8 = vsel %vm627_vm0, %v1695_v46, 0.0 }
 0xbe0   : > { %1701 = vadd.xlane.f32.xlu1 %v1700_v4  ;;  %1704 = vadd.xlane.f32.xlu0 %v1703_v8 }
 0xbe1   : > { %v1696_v10 = vmul.f32 %v1692_v47, %v1692_v47 }
 0xbe3   : > { %v1706_v11 = vsel %vm627_vm0, %v1696_v10, 0.0 }
 0xbe4   : > { %1707 = vadd.xlane.f32.xlu1 %v1706_v11 }
 0xc65   : > { %v1699_v19 = vpop.xlane.xlu0 %1698 }
 0xc66   : > { %v1709_v20 = vmul.f32 0.03125, %v1699_v19 }
 0xc68   : > { %v1713_v22 = vadd.f32 1e-05, %v1709_v20 }
 0xc69   : > { %v1702_v24 = vpop.xlane.xlu1 %1701  ;;  %v1705_v26 = vpop.xlane.xlu0 %1704 }
 0xc6a   : > { %3530 = vrsqrt.f32 %v1713_v22  ;;  %v1710_v27 = vmul.f32 0.03125, %v1702_v24  ;;  %v1711_v28 = vmul.f32 0.03125, %v1705_v26 }
 0xc6c   : > { %v1714_v31 = vadd.f32 1e-05, %v1710_v27  ;;  %v1715_v32 = vadd.f32 1e-05, %v1711_v28 }
 0xc6d   : > { %v1708_v5 = vpop.xlane.xlu1 %1707 }
 0xc6e   : > { %3532 = vrsqrt.f32 %v1714_v31  ;;  %v1712_v35 = vmul.f32 0.03125, %v1708_v5 }
 0xc6f   : > { %3534 = vrsqrt.f32 %v1715_v32 }
 0xc70   : > { %v1716_v9 = vadd.f32 1e-05, %v1712_v35 }
 0xc72   : > { %3536 = vrsqrt.f32 %v1716_v9 }
 0xc77   : > { %v3531_v36 = vpop.eup %3530 }
 0xc78   : > { %v1721_v37 = vmul.f32 %v3531_v36, %v1689_v33 }
 0xc7a   : > { %v1731_v42 = vmul.f32 %v3057_v7, %v1721_v37 }
 0xc7b   : > { %v3533_v38 = vpop.eup %3532 }
 0xc7c   : > { %v3535_v41 = vpop.eup %3534  ;;  %v1722_v6 = vmul.f32 %v3533_v38, %v1690_v51  ;;  %v1741_v54 = vadd.f32 %v3058_v48, %v1731_v42 }
 0xc7d   : > { %v1723_v44 = vmul.f32 %v3535_v41, %v1691_v0 }
 0xc7e   : > { %v1732_v49 = vmul.f32 %v3057_v7, %v1722_v6 }
 0xc7f   : > { %v3537_v21 = vpop.eup %3536  ;;  %v1733_v56 = vmul.f32 %v3057_v7, %v1723_v44 }
 0xc80   : > { %v1724_v52 = vmul.f32 %v3537_v21, %v1692_v47  ;;  %v1742_v55 = vadd.f32 %v3058_v48, %v1732_v49 }
 0xc81   : > { %v1743_v34 = vadd.f32 %v3058_v48, %v1733_v56 }
 0xc82   : > { %v1750_v25 = vpack.c.bf16 %v1742_v55, %v1741_v54  ;;  %v1734_v59 = vmul.f32 %v3057_v7, %v1724_v52 }
 0xc84   : > { %3313 = vmatprep.mubr.msk.bf16.mxu1 %vm627_vm0, %v1750_v25  ;;  %v1744_v60 = vadd.f32 %v3058_v48, %v1734_v59 }
 0xc86   : > { %v1751_v61 = vpack.c.bf16 %v1744_v60, %v1743_v34 }
 0xc88   : > { %3314 = vmatmul.mubr.msk.bf16.vlgmr.msra.gmra.mxu1 %vm627_vm0, %v1751_v61 }
 0xc89   : > { %3319 = vmatprep.mubr.msk.bf16.mxu1 %vm3665_vm1, %v3664_v12 }
 0xd48   : > { %v3315_v33 = vpop.f32.mrf.mxu1 }
 0xd49   : > { %v1811_v45 = vadd.f32 %v3315_v33, %v3064_v62 }
 0xd4a   : > { %v1802_v63 = vpop.f32.mrf.mxu1 }
 0xd4b   : > { %v1803_v0 = vadd.f32 %v3064_v62, %v1802_v63 }
 0xd4c   : > { %v3316_v30 = vpop.f32.mrf.mxu1 }
 0xd4d   : > { %v1814_v50 = vadd.f32 %v3316_v30, %v3064_v62 }
 0xd4e   : > { %v1805_v51 = vpop.f32.mrf.mxu1 }
 0xd4f   : > { %v4172_v1 = vpack.c.bf16 %v1814_v50, %v1811_v45  ;;  %v1806_v2 = vadd.f32 %v3064_v62, %v1805_v51 }
 0xd51   : > { %v4174_v3 = vpack.c.bf16 %v1806_v2, %v1803_v0  ;;  %1875 = vrot.lane.b32.xlu1 %v4172_v1, %s3666_s19 }
 0xd53   : > { %1825 = vrot.lane.b32.xlu0 %v4174_v3, %s3666_s19  ;;  %s4533_s19 = smov 64  }
 0xdc3   : > { %v1876_v47 = vpop.permute.xlu1 %1875 }
 0xdc4   : > { %v1881_v4 = vsel %vm780_vm2, %v1876_v47, 0 }
 0xdc5   : > { %v1826_v43 = vpop.permute.xlu0 %1825 }
 0xdc6   : > { %v1831_v46 = vsel %vm780_vm2, %v1826_v43, 0 }
 0xdc7   : > { %3318 = vmatpush3.bf16.xpose.msra.mxu1 %v1831_v46 }
 0xdc8   : > { %3323 = vmatprep.subr.bf16.mxu1 %v3664_v12 }
 0xdce   : > { %3320 = vmatmul.mubr.msk.bf16.vlgmr.msra.gmra.mxu1 %vm780_vm2, %v4174_v3 }
 0xdcf   : > { %3324 = vmatpush3.bf16.xpose.msra.mxu1 %v1881_v4  ;;  %3325 = vmatprep.mubr.msk.bf16.mxu1 %vm3665_vm1, %v3664_v12 }
 0xdd0   : > { %3329 = vmatprep.subr.bf16.mxu1 %v3664_v12 }
 0xdd6   : > { %3326 = vmatmul.mubr.msk.bf16.vlgmr.msra.gmra.mxu1 %vm780_vm2, %v4172_v1 }
 0xdd7   : > { %3331 = vmatprep.mubr.msk.bf16.mxu1 %vm3665_vm1, %v3664_v12 }
 0xe8e   : > { %v1867_v8 = vpop.f32.mrf.mxu1 }
 0xe8f   : > { %v1924_v10 = vmul.f32 0.25, %v1867_v8 }
 0xe90   : > { %v3321_v11 = vpop.f32.mrf.mxu1 }
 0xe91   : > { %v1928_v13 = vadd.f32 %v1924_v10, %v3912_v39 }
 0xe92   : > { %v1870_v14 = vpop.f32.mrf.mxu1 }
 0xe93   : > { %v1925_v15 = vmul.f32 0.25, %v1870_v14  ;;  %v1932_v16 = vsel %vm780_vm2, %v1928_v13, -inf }
 0xe94   : > { %1933 = vmax.xlane.f32.xlu1 %v1932_v16  ;;  %v3322_v17 = vpop.f32.mrf.mxu1 }
 0xe95   : > { %v1929_v18 = vadd.f32 %v1925_v15, %v3914_v40 }
 0xe96   : > { %v1917_v19 = vpop.f32.mrf.mxu1 }
 0xe97   : > { %v1926_v20 = vmul.f32 0.25, %v1917_v19  ;;  %v1935_v22 = vsel %vm780_vm2, %v1929_v18, -inf }
 0xe98   : > { %1936 = vmax.xlane.f32.xlu0 %v1935_v22  ;;  %v3327_v24 = vpop.f32.mrf.mxu1 }
 0xe99   : > { %v1930_v26 = vadd.f32 %v1926_v20, %v3912_v39 }
 0xe9a   : > { %v1920_v27 = vpop.f32.mrf.mxu1 }
 0xe9b   : > { %v1927_v28 = vmul.f32 0.25, %v1920_v27  ;;  %v1938_v31 = vsel %vm780_vm2, %v1930_v26, -inf }
 0xe9c   : > { %1939 = vmax.xlane.f32.xlu0 %v1938_v31  ;;  %v3328_v32 = vpop.f32.mrf.mxu1 }
 0xe9d   : > { %v1931_v5 = vadd.f32 %v1927_v28, %v3914_v40 }
 0xe9f   : > { %v1941_v35 = vsel %vm780_vm2, %v1931_v5, -inf }
 0xea0   : > { %1942 = vmax.xlane.f32.xlu1 %v1941_v35 }
 0xf1d   : > { %v1934_v9 = vpop.xlane.xlu1 %1933 }
 0xf1e   : > { %v1944_v36 = vsub.f32 %v1928_v13, %v1934_v9 }
 0xf20   : > { %v1948_v37 = vmul.f32 1.442695, %v1944_v36 }
 0xf21   : > { %v1937_v7 = vpop.xlane.xlu0 %1936 }
 0xf22   : > { %3538 = vpow2.f32 %v1948_v37  ;;  %v1945_v38 = vsub.f32 %v1929_v18, %v1937_v7 }
 0xf24   : > { %v1950_v41 = vmul.f32 1.442695, %v1945_v38 }
 0xf25   : > { %v1940_v6 = vpop.xlane.xlu0 %1939 }
 0xf26   : > { %3540 = vpow2.f32 %v1950_v41  ;;  %v1946_v42 = vsub.f32 %v1930_v26, %v1940_v6 }
 0xf28   : > { %v1952_v44 = vmul.f32 1.442695, %v1946_v42 }
 0xf29   : > { %v1943_v56 = vpop.xlane.xlu1 %1942 }
 0xf2a   : > { %3542 = vpow2.f32 %v1952_v44  ;;  %v1947_v25 = vsub.f32 %v1931_v5, %v1943_v56 }
 0xf2c   : > { %v1954_v59 = vmul.f32 1.442695, %v1947_v25 }
 0xf2e   : > { %3544 = vpow2.f32 %v1954_v59 }
 0xf2f   : > { %v3539_v48 = vpop.eup %3538 }
 0xf30   : > { %v1956_v49 = vsel %vm780_vm2, %v3539_v48, 0.0 }
 0xf31   : > { %1957 = vadd.xlane.f32.xlu0 %v1956_v49 }
 0xf33   : > { %v3541_v21 = vpop.eup %3540 }
 0xf34   : > { %v1959_v52 = vsel %vm780_vm2, %v3541_v21, 0.0 }
 0xf35   : > { %1960 = vadd.xlane.f32.xlu1 %v1959_v52 }
 0xf37   : > { %v3543_v54 = vpop.eup %3542 }
 0xf38   : > { %v1962_v55 = vsel %vm780_vm2, %v3543_v54, 0.0 }
 0xf39   : > { %1963 = vadd.xlane.f32.xlu0 %v1962_v55 }
 0xf3b   : > { %v3545_v34 = vpop.eup %3544 }
 0xf3c   : > { %v1965_v60 = vsel %vm780_vm2, %v3545_v34, 0.0 }
 0xf46   : > { %2025 = vrot.lane.b32.xlu1 %v4172_v1, %s4533_s19 }
 0xf4a   : > { %2077 = vrot.lane.b32.xlu1 %v4174_v3, %s4534_s25 }
 0xf4f   : > { %1978 = vrot.lane.b32.xlu0 %v4174_v3, %s4533_s19  ;;  %s3129_s19 = sshll.u32 %s3793_s0, 5  ;;  %s4445_s0 = scalar_lea.sflag [#allocation3], %s587_s29 }
 0xf53   : > { %2075 = vrot.lane.b32.xlu0 %v4174_v3, %s4535_s22 }
 0xf6e   : > { %1966 = vadd.xlane.f32.xlu1 %v1965_v60 }
 0xf7f   : > { %2128 = vrot.lane.b32.xlu1 %v4172_v1, %s4534_s25 }
 0xf83   : > { %2126 = vrot.lane.b32.xlu1 %v4172_v1, %s4535_s22  ;;  %s4538_s22 = sld [smem:[#allocation11_spill]] }
 0xfba   : > { %v1958_v61 = vpop.xlane.xlu0 %1957 }
 0xfbb   : > { %3546 = vrcp.f32 %v1958_v61 }
 0xfbe   : > { %v1961_v33 = vpop.xlane.xlu1 %1960 }
 0xfbf   : > { %3548 = vrcp.f32 %v1961_v33 }
 0xfc2   : > { %v1964_v62 = vpop.xlane.xlu0 %1963  ;;  %v2026_v63 = vpop.permute.xlu1 %2025 }
 0xfc3   : > { %3336 = vmatpush3.bf16.msra.mxu0 %v2026_v63  ;;  %3550 = vrcp.f32 %v1964_v62 }
 0xfc4   : > { %3347 = vmatprep.subr.bf16.mxu0 %v3664_v12 }
 0xfc6   : > { %v1979_v30 = vpop.permute.xlu0 %1978  ;;  %v2078_v2 = vpop.permute.xlu1 %2077 }
 0xfc7   : > { %3330 = vmatpush3.bf16.msra.mxu1 %v1979_v30  ;;  %v2083_v46 = vsel %vm780_vm2, %v2078_v2, 0 }
 0xfc8   : > { %3341 = vmatprep.subr.bf16.mxu1 %v3664_v12  ;;  %v3547_v45 = vpop.eup %3546 }
 0xfc9   : > { %v1972_v51 = vmul.f32 %v3547_v45, %v3539_v48 }
 0xfca   : > { %v2076_v47 = vpop.permute.xlu0 %2075 }
 0xfcc   : > { %v3549_v50 = vpop.eup %3548 }
 0xfcd   : > { %v1973_v0 = vmul.f32 %v3549_v50, %v3541_v21 }
 0xfcf   : > { %v1976_v43 = vpack.c.bf16 %v1973_v0, %v1972_v51 }
 0xfd0   : > { %v3551_v8 = vpop.eup %3550 }
 0xfd1   : > { %3332 = vmatmul.mubr.msk.bf16.vlgmr.msra.gmra.mxu1 %vm780_vm2, %v1976_v43  ;;  %v1974_v11 = vmul.f32 %v3551_v8, %v3543_v54 }
 0xfd2   : > { %3342 = vmatpush3.bf16.xpose.msra.mxu1 %v2083_v46  ;;  %3343 = vmatprep.mubr.msk.bf16.mxu1 %vm3665_vm1, %v3664_v12 }
 0xfd3   : > { %3353 = vmatprep.subr.bf16.mxu1 %v3664_v12 }
 0xfd9   : > { %3344 = vmatmul.mubr.msk.bf16.vlgmr.msra.gmra.mxu1 %vm780_vm2, %v2076_v47 }
 0xfda   : > { %3355 = vmatprep.mubr.msk.bf16.mxu1 %vm3665_vm1, %v3664_v12 }
 0xff7   : > { %v1967_v4 = vpop.xlane.xlu1 %1966 }
 0xff8   : > { %3552 = vrcp.f32 %v1967_v4 }
 0xffb   : > { %v2129_v14 = vpop.permute.xlu1 %2128 }
 0xffc   : > { %v2134_v16 = vsel %vm780_vm2, %v2129_v14, 0 }
 0xfff   : > { %v2127_v17 = vpop.permute.xlu1 %2126 }
0x1005   : > { %v3553_v10 = vpop.eup %3552 }
0x1006   : > { %v1975_v13 = vmul.f32 %v3553_v10, %v3545_v34 }
0x1008   : > { %v1977_v15 = vpack.c.bf16 %v1975_v13, %v1974_v11 }
0x100a   : > { %3338 = vmatmul.mubr.msk.bf16.vlgmr.msra.gmra.mxu0 %vm780_vm2, %v1977_v15 }
0x100b   : > { %3348 = vmatpush3.bf16.xpose.msra.mxu0 %v2134_v16  ;;  %3349 = vmatprep.mubr.msk.bf16.mxu0 %vm3665_vm1, %v3664_v12 }
0x100c   : > { %3359 = vmatprep.subr.bf16.mxu0 %v3664_v12 }
0x1012   : > { %3350 = vmatmul.mubr.msk.bf16.vlgmr.msra.gmra.mxu0 %vm780_vm2, %v2127_v17 }
0x1013   : > { %3361 = vmatprep.mubr.msk.bf16.mxu0 %vm3665_vm1, %v3664_v12 }
0x1091   : > { %v4234_v18 = vpop.f32.mrf.mxu1 }
0x1093   : > { %v3333_v19 = vpop.f32.mrf.mxu1 }
0x1094   : > { %v3067_v19 = vld [vmem:[%s4492_s7 + $0x20] sm:$0xff] }
0x1095   : > { %v4236_v20 = vpop.f32.mrf.mxu1 }
0x1096   : > { %v2072_v22 = vpack.c.bf16 %v4236_v20, %v4234_v18 }
0x1097   : > { %v3334_v24 = vpop.f32.mrf.mxu1 }
0x1099   : > { %v2119_v26 = vpop.f32.mrf.mxu1 }
0x109a   : > { %v2177_v27 = vmul.f32 0.25, %v2119_v26 }
0x109b   : > { %v3345_v28 = vpop.f32.mrf.mxu1 }
0x109c   : > { %v2181_v31 = vadd.f32 %v2177_v27, %v3912_v39 }
0x109d   : > { %v2122_v32 = vpop.f32.mrf.mxu1 }
0x109e   : > { %v2178_v5 = vmul.f32 0.25, %v2122_v32  ;;  %v2185_v35 = vsel %vm780_vm2, %v2181_v31, -inf }
0x109f   : > { %2186 = vmax.xlane.f32.xlu0 %v2185_v35  ;;  %v3346_v9 = vpop.f32.mrf.mxu1 }
0x10a0   : > { %v2182_v36 = vadd.f32 %v2178_v5, %v3914_v40 }
0x10a2   : > { %v2188_v37 = vsel %vm780_vm2, %v2182_v36, -inf }
0x10a3   : > { %2189 = vmax.xlane.f32.xlu1 %v2188_v37  ;;  %v3069_v37 = vld [vmem:[%s4492_s7 + $0x30] sm:$0xff] }
0x10ca   : > { %v4244_v7 = vpop.f32.mrf.mxu0 }
0x10cc   : > { %v3339_v38 = vpop.f32.mrf.mxu0 }
0x10cd   : > { %v3070_v38 = vld [vmem:[%s4492_s7 + $0x38] sm:$0xff] }
0x10ce   : > { %v4246_v41 = vpop.f32.mrf.mxu0 }
0x10cf   : > { %v2073_v6 = vpack.c.bf16 %v4246_v41, %v4244_v7 }
0x10d0   : > { %v3340_v42 = vpop.f32.mrf.mxu0 }
0x10d1   : > { %v2327_v42 = vpack.c.bf16 %v3070_v38, %v3069_v37  ;;  %v3090_v37 = vld [vmem:[%s4496_s11 + $0x28] sm:$0xff] }
0x10d2   : > { %v2170_v44 = vpop.f32.mrf.mxu0 }
0x10d3   : > { %v2179_v48 = vmul.f32 0.25, %v2170_v44 }
0x10d4   : > { %v3351_v49 = vpop.f32.mrf.mxu0 }
0x10d5   : > { %v2183_v21 = vadd.f32 %v2179_v48, %v3912_v39 }
0x10d6   : > { %v2173_v52 = vpop.f32.mrf.mxu0 }
0x10d7   : > { %v2180_v54 = vmul.f32 0.25, %v2173_v52  ;;  %v2191_v55 = vsel %vm780_vm2, %v2183_v21, -inf }
0x10d8   : > { %v3352_v56 = vpop.f32.mrf.mxu0  ;;  %2192 = vmax.xlane.f32.xlu0 %v2191_v55 }
0x10d9   : > { %v2184_v25 = vadd.f32 %v2180_v54, %v3914_v40 }
0x10db   : > { %v2194_v59 = vsel %vm780_vm2, %v2184_v25, -inf }
0x10dc   : > { %2195 = vmax.xlane.f32.xlu0 %v2194_v59 }
0x1128   : > { %v2187_v34 = vpop.xlane.xlu0 %2186 }
0x1129   : > { %v2197_v60 = vsub.f32 %v2181_v31, %v2187_v34  ;;  %v3084_v34 = vld [vmem:[%s4493_s8 + $0x1] ss:$0 sm:$0xff] }
0x112b   : > { %v2201_v61 = vmul.f32 1.442695, %v2197_v60 }
0x112c   : > { %v2190_v33 = vpop.xlane.xlu1 %2189 }
0x112d   : > { %3554 = vpow2.f32 %v2201_v61  ;;  %v2198_v62 = vsub.f32 %v2182_v36, %v2190_v33 }
0x112f   : > { %v2203_v63 = vmul.f32 1.442695, %v2198_v62 }
0x1131   : > { %3556 = vpow2.f32 %v2203_v63 }
0x113a   : > { %v3555_v39 = vpop.eup %3554 }
0x113b   : > { %v2209_v30 = vsel %vm780_vm2, %v3555_v39, 0.0 }
0x113c   : > { %2210 = vadd.xlane.f32.xlu0 %v2209_v30 }
0x113e   : > { %v3557_v45 = vpop.eup %3556 }
0x113f   : > { %v2212_v50 = vsel %vm780_vm2, %v3557_v45, 0.0 }
0x1140   : > { %2213 = vadd.xlane.f32.xlu1 %v2212_v50 }
0x1161   : > { %v2193_v40 = vpop.xlane.xlu0 %2192 }
0x1162   : > { %v2199_v51 = vsub.f32 %v2183_v21, %v2193_v40 }
0x1164   : > { %v2205_v0 = vmul.f32 1.442695, %v2199_v51 }
0x1165   : > { %v2196_v2 = vpop.xlane.xlu0 %2195 }
0x1166   : > { %3558 = vpow2.f32 %v2205_v0  ;;  %v2200_v43 = vsub.f32 %v2184_v25, %v2196_v2 }
0x1168   : > { %v2207_v46 = vmul.f32 1.442695, %v2200_v43 }
0x116a   : > { %3560 = vpow2.f32 %v2207_v46 }
0x1173   : > { %v3559_v47 = vpop.eup %3558 }
0x1174   : > { %v2215_v4 = vsel %vm780_vm2, %v3559_v47, 0.0 }
0x1175   : > { %2216 = vadd.xlane.f32.xlu0 %v2215_v4 }
0x1177   : > { %v3561_v8 = vpop.eup %3560 }
0x1178   : > { %v2218_v10 = vsel %vm780_vm2, %v3561_v8, 0.0 }
0x1179   : > { %2219 = vadd.xlane.f32.xlu1 %v2218_v10 }
0x118a   : > { %2278 = vrot.lane.b32.xlu1 %v4172_v1, %s4536_s21  ;;  %v3068_v1 = vld [vmem:[%s4492_s7 + $0x28] sm:$0xff] }
0x118b   : > { %2231 = vrot.lane.b32.xlu0 %v4174_v3, %s4536_s21  ;;  %v2074_v28 = vpack.c.bf16 %v3068_v1, %v3067_v19  ;;  %s602_s21 = scalar_lea.vmem %s4538_s22, %s4537_s26  ;;  %s2942_s26 = sshll.u32 %s589_s23, 4  ;;  %s4443_s26 = int_to_ptr.vmem [resolvable:$true] %s2942_s26 }
0x118c   : > { %s3602_s24 = scalar_lea.vmem %s4443_s26, 32  ;;  %p3609_p0 = scmp.lt.s32.totalorder %s4443_s26, %s3607_s1 }
0x118d   : > { %p3603_p11 = scmp.ne.s32.totalorder %s4443_s26, %s3602_s24 }
0x118f   : > { %p3604_p12 = pnand %p3603_p11, %p3810_p5 }
0x1191   : > { %p3605_p13 = pneg %p3604_p12 }
0x11c5   : > { %v2211_v13 = vpop.xlane.xlu0 %2210 }
0x11c9   : > { %v2214_v11 = vpop.xlane.xlu1 %2213 }
0x11ca   : > { %3562 = vrcp.f32 %v2214_v11 }
0x11cb   : > { %3564 = vrcp.f32 %v2211_v13 }
0x11d7   : > { %v3563_v14 = vpop.eup %3562 }
0x11d8   : > { %v3565_v16 = vpop.eup %3564  ;;  %v2226_v17 = vmul.f32 %v3563_v14, %v3557_v45 }
0x11d9   : > { %v2225_v3 = vmul.f32 %v3565_v16, %v3555_v39 }
0x11db   : > { %v2229_v27 = vpack.c.bf16 %v2226_v17, %v2225_v3 }
0x11fe   : > { %v2217_v15 = vpop.xlane.xlu0 %2216 }
0x11ff   : > { %3566 = vrcp.f32 %v2217_v15 }
0x1202   : > { %v2232_v24 = vpop.permute.xlu0 %2231  ;;  %v2220_v26 = vpop.xlane.xlu1 %2219 }
0x1203   : > { %3568 = vrcp.f32 %v2220_v26  ;;  %3354 = vmatpush3.bf16.msra.mxu1 %v2232_v24 }
0x1204   : > { %3365 = vmatprep.subr.bf16.mxu1 %v2327_v42 }
0x1206   : > { %3356 = vmatmul.mubr.msk.bf16.vlgmr.msra.gmra.mxu1 %vm780_vm2, %v2229_v27  ;;  %v2279_v31 = vpop.permute.xlu1 %2278 }
0x1207   : > { %3360 = vmatpush3.bf16.msra.mxu0 %v2279_v31  ;;  %3366 = vmatpush3.bf16.msra.mxu1 %v2327_v42 }
0x1208   : > { %3371 = vmatprep.subr.bf16.mxu0 %v2074_v28 }
0x120c   : > { %v3567_v32 = vpop.eup %3566 }
0x120d   : > { %v2227_v35 = vmul.f32 %v3567_v32, %v3559_v47 }
0x1210   : > { %v3569_v5 = vpop.eup %3568 }
0x1211   : > { %v2228_v9 = vmul.f32 %v3569_v5, %v3561_v8  ;;  %v3091_v5 = vld [vmem:[%s4496_s11 + $0x30] sm:$0xff] }
0x1213   : > { %v2230_v36 = vpack.c.bf16 %v2228_v9, %v2227_v35  ;;  %v3092_v35 = vld [vmem:[%s4496_s11 + $0x38] sm:$0xff] }
0x1214   : > { %v2538_v9 = vpack.c.bf16 %v3092_v35, %v3091_v5  ;;  %v3101_v35 = vld [vmem:[%s4498_s13 + $0x80] sm:$0xff] }
0x1215   : > { %3362 = vmatmul.mubr.msk.bf16.vlgmr.msra.gmra.mxu0 %vm780_vm2, %v2230_v36  ;;  %v3089_v36 = vld [vmem:[%s4496_s11 + $0x20] sm:$0xff] }
0x1216   : > { %3373 = vmatprep.mubr.msk.bf16.mxu0 %vm780_vm2, %v2072_v22  ;;  %3372 = vmatpush3.bf16.msra.mxu0 %v2074_v28  ;;  %v2537_v38 = vpack.c.bf16 %v3090_v37, %v3089_v36  ;;  %v3094_v37 = vld [vmem:[%s4497_s12 + $0x1] ss:$0 sm:$0xff] }
0x1217   : > { %3377 = vmatprep.subr.bf16.mxu1 %v2538_v9 }
0x121d   : > { %3374 = vmatmul.mubr.msk.bf16.vlgmr.msra.gmra.mxu0 %vm780_vm2, %v2073_v6 }
0x12c6   : > { %v2271_v18 = vpop.f32.mrf.mxu1 }
0x12c8   : > { %v3357_v20 = vpop.f32.mrf.mxu1 }
0x12ca   : > { %v2274_v22 = vpop.f32.mrf.mxu1 }
0x12cb   : > { %v2325_v44 = vpack.c.bf16 %v2274_v22, %v2271_v18 }
0x12cc   : > { %v3358_v48 = vpop.f32.mrf.mxu1 }
0x12cd   : > { %3367 = vmatprep.mubr.msk.bf16.mxu1 %vm780_vm2, %v2325_v44 }
0x12d5   : > { %v2318_v7 = vpop.f32.mrf.mxu0 }
0x12d7   : > { %v3363_v41 = vpop.f32.mrf.mxu0 }
0x12d9   : > { %v2321_v6 = vpop.f32.mrf.mxu0 }
0x12da   : > { %v2326_v49 = vpack.c.bf16 %v2321_v6, %v2318_v7 }
0x12db   : > { %v3364_v21 = vpop.f32.mrf.mxu0 }
0x12dc   : > { %3368 = vmatmul.mubr.msk.bf16.vlgmr.msra.gmra.mxu1 %vm780_vm2, %v2326_v49 }
0x12dd   : > { %v3375_v52 = vpop.f32.mrf.mxu0  ;;  %3378 = vmatpush3.bf16.msra.mxu1 %v2538_v9  ;;  %v3102_v9 = vld [vmem:[%s4498_s13 + $0x88] sm:$0xff] }
0x12de   : > { %3379 = vmatprep.subr.bf16.mxu1 %v2537_v38  ;;  %v2653_v36 = vpack.c.bf16 %v3102_v9, %v3101_v35 }
0x12df   : > { %v2423_v54 = vpop.f32.mrf.mxu0 }
0x12e1   : > { %v3376_v56 = vpop.f32.mrf.mxu0  ;;  %3380 = vmatpush3.bf16.msra.mxu1 %v2537_v38 }
0x12e2   : > { %3405 = vmatprep.subr.bf16.mxu1 %v3664_v12 }
0x12e3   : > { %v2426_v63 = vpop.f32.mrf.mxu0 }
0x139c   : > { %v3369_v55 = vpop.f32.mrf.mxu1 }
0x139d   : > { %v2432_v61 = vadd.f32 %v3375_v52, %v3369_v55 }
0x139e   : > { %v2368_v25 = vpop.f32.mrf.mxu1 }
0x139f   : > { %v2424_v59 = vadd.f32 %v2423_v54, %v2368_v25  ;;  %v2448_v40 = vadd.f32 %v3084_v34, %v2432_v61 }
0x13a0   : > { %v3370_v60 = vpop.f32.mrf.mxu1 }
0x13a1   : > { %v2446_v33 = vadd.f32 %v3084_v34, %v2424_v59  ;;  %v2435_v62 = vadd.f32 %v3376_v56, %v3370_v60  ;;  %v4301_v46 = vadd.f32 %v2448_v40, %v4122_v53  ;;  %v3087_v56 = vld [vmem:[%s4494_s9 + $0x1] ss:$0 sm:$0xff] }
0x13a2   : > { %v2371_v39 = vpop.f32.mrf.mxu1  ;;  %v3088_v60 = vld [vmem:[%s4495_s10 + $0x1] ss:$0 sm:$0xff] }
0x13a3   : > { %v4290_v30 = vadd.f32 %v2446_v33, %v4119_v23  ;;  %v2449_v45 = vadd.f32 %v3084_v34, %v2435_v62  ;;  %v2427_v50 = vadd.f32 %v2426_v63, %v2371_v39 }
0x13a5   : > { %v4293_v51 = vadd.f32 %v2449_v45, %v4130_v58  ;;  %v2447_v0 = vadd.f32 %v3084_v34, %v2427_v50  ;;  %v2458_v2 = vsel %vm627_vm0, %v4290_v30, 0.0  ;;  %v2464_v58 = vsel %vm627_vm0, %v4301_v46, 0.0 }
0x13a6   : > { %2459 = vadd.xlane.f32.xlu1 %v2458_v2 }
0x13a7   : > { %v4298_v43 = vadd.f32 %v2447_v0, %v4127_v57  ;;  %v2467_v23 = vsel %vm627_vm0, %v4293_v51, 0.0 }
0x13a9   : > { %v2461_v47 = vsel %vm627_vm0, %v4298_v43, 0.0 }
0x13aa   : > { %2468 = vadd.xlane.f32.xlu1 %v2467_v23  ;;  %2462 = vadd.xlane.f32.xlu0 %v2461_v47 }
0x13ae   : > { %2465 = vadd.xlane.f32.xlu0 %v2464_v58 }
0x142f   : > { %v2460_v4 = vpop.xlane.xlu1 %2459 }
0x1430   : > { %v2470_v8 = vmul.f32 0.03125, %v2460_v4  ;;  %v3115_v4 = vld [vmem:[%s4498_s13 + $0xf0] sm:$0xff] }
0x1432   : > { %v2474_v57 = vsub.f32 %v4290_v30, %v2470_v8  ;;  %v3116_v8 = vld [vmem:[%s4498_s13 + $0xf8] sm:$0xff] }
0x1433   : > { %v2469_v10 = vpop.xlane.xlu1 %2468  ;;  %v2463_v11 = vpop.xlane.xlu0 %2462 }
0x1434   : > { %v2473_v53 = vmul.f32 0.03125, %v2469_v10  ;;  %v2471_v13 = vmul.f32 0.03125, %v2463_v11  ;;  %v2478_v14 = vmul.f32 %v2474_v57, %v2474_v57  ;;  %v3113_v10 = vld [vmem:[%s4498_s13 + $0xe0] sm:$0xff]  ;;  %v3114_v11 = vld [vmem:[%s4498_s13 + $0xe8] sm:$0xff] }
0x1436   : > { %v2477_v15 = vsub.f32 %v4293_v51, %v2473_v53  ;;  %v2475_v16 = vsub.f32 %v4298_v43, %v2471_v13  ;;  %v2482_v17 = vsel %vm627_vm0, %v2478_v14, 0.0  ;;  %v2659_v53 = vpack.c.bf16 %v3114_v11, %v3113_v10  ;;  %v3111_v13 = vld [vmem:[%s4498_s13 + $0xd0] sm:$0xff]  ;;  %v3112_v14 = vld [vmem:[%s4498_s13 + $0xd8] sm:$0xff]  ;;  %v3118_v10 = vld [vmem:[%s4499_s14 + $0x1] ss:$0 sm:$0xff] }
0x1437   : > { %2483 = vadd.xlane.f32.xlu0 %v2482_v17  ;;  %v2466_v19 = vpop.xlane.xlu0 %2465  ;;  %v3110_v17 = vld [vmem:[%s4498_s13 + $0xc8] sm:$0xff] }
0x1438   : > { %v2472_v1 = vmul.f32 0.03125, %v2466_v19  ;;  %v2479_v24 = vmul.f32 %v2475_v16, %v2475_v16  ;;  %v2481_v27 = vmul.f32 %v2477_v15, %v2477_v15 }
0x143a   : > { %v2476_v26 = vsub.f32 %v4301_v46, %v2472_v1  ;;  %v2485_v3 = vsel %vm627_vm0, %v2479_v24, 0.0  ;;  %v2491_v31 = vsel %vm627_vm0, %v2481_v27, 0.0  ;;  %v3107_v1 = vld [vmem:[%s4498_s13 + $0xb0] sm:$0xff]  ;;  %v3108_v24 = vld [vmem:[%s4498_s13 + $0xb8] sm:$0xff]  ;;  %v3106_v27 = vld [vmem:[%s4498_s13 + $0xa8] sm:$0xff] }
0x143b   : > { %2486 = vadd.xlane.f32.xlu1 %v2485_v3  ;;  %v3105_v3 = vld [vmem:[%s4498_s13 + $0xa0] sm:$0xff] }
0x143c   : > { %v2480_v28 = vmul.f32 %v2476_v26, %v2476_v26 }
0x143e   : > { %v2488_v32 = vsel %vm627_vm0, %v2480_v28, 0.0  ;;  %v2655_v28 = vpack.c.bf16 %v3106_v27, %v3105_v3 }
0x143f   : > { %2492 = vadd.xlane.f32.xlu1 %v2491_v31  ;;  %2489 = vadd.xlane.f32.xlu0 %v2488_v32  ;;  %v3103_v31 = vld [vmem:[%s4498_s13 + $0x90] sm:$0xff]  ;;  %v3104_v32 = vld [vmem:[%s4498_s13 + $0x98] sm:$0xff] }
0x1440   : > { %v2654_v5 = vpack.c.bf16 %v3104_v32, %v3103_v31  ;;  %v2798_v31 = vld [vmem:[%s602_s21 + $0x10] sm:$0xff] }
0x14c0   : > { %v2484_v42 = vpop.xlane.xlu0 %2483 }
0x14c1   : > { %v2494_v18 = vmul.f32 0.03125, %v2484_v42 }
0x14c3   : > { %v2498_v20 = vadd.f32 1e-05, %v2494_v18 }
0x14c4   : > { %v2487_v22 = vpop.xlane.xlu1 %2486 }
0x14c5   : > { %3570 = vrsqrt.f32 %v2498_v20  ;;  %v2495_v44 = vmul.f32 0.03125, %v2487_v22 }
0x14c7   : > { %v2499_v48 = vadd.f32 1e-05, %v2495_v44 }
0x14c8   : > { %v2493_v7 = vpop.xlane.xlu1 %2492  ;;  %v2490_v41 = vpop.xlane.xlu0 %2489 }
0x14c9   : > { %3572 = vrsqrt.f32 %v2499_v48  ;;  %v2497_v6 = vmul.f32 0.03125, %v2493_v7  ;;  %v2496_v49 = vmul.f32 0.03125, %v2490_v41 }
0x14cb   : > { %v2501_v21 = vadd.f32 1e-05, %v2497_v6  ;;  %v2500_v52 = vadd.f32 1e-05, %v2496_v49 }
0x14cd   : > { %3574 = vrsqrt.f32 %v2501_v21 }
0x14ce   : > { %3576 = vrsqrt.f32 %v2500_v52 }
0x14d2   : > { %v3571_v54 = vpop.eup %3570 }
0x14d3   : > { %v2506_v55 = vmul.f32 %v3571_v54, %v2474_v57  ;;  %v2660_v57 = vpack.c.bf16 %v3116_v8, %v3115_v4  ;;  %v3672_v8 = vmov 0  }
0x14d4   : > { %3465 = vset.pattern.permute.xlu1 %v3672_v8  ;;  %3464 = vset.pattern.permute.xlu0 %v3672_v8  ;;  %v3119_v8 = vld [vmem:[%s4500_s15] ss:$0 sm:$0xff] }
0x14d5   : > { %v2516_v34 = vmul.f32 %v3087_v56, %v2506_v55  ;;  %3385 = vmatprep.subr.bf16.mxu0 %v2660_v57 }
0x14d6   : > { %v3573_v25 = vpop.eup %3572  ;;  %3386 = vmatpush3.bf16.msra.mxu0 %v2660_v57 }
0x14d7   : > { %v2507_v59 = vmul.f32 %v3573_v25, %v2475_v16  ;;  %v2526_v39 = vadd.f32 %v3088_v60, %v2516_v34  ;;  %3387 = vmatprep.subr.bf16.mxu0 %v2659_v53  ;;  %v3109_v16 = vld [vmem:[%s4498_s13 + $0xc0] sm:$0xff] }
0x14d8   : > { %v2657_v19 = vpack.c.bf16 %v3110_v17, %v3109_v16 }
0x14d9   : > { %v2517_v61 = vmul.f32 %v3087_v56, %v2507_v59 }
0x14da   : > { %v3575_v33 = vpop.eup %3574  ;;  %3388 = vmatpush3.bf16.msra.mxu0 %v2659_v53 }
0x14db   : > { %v3577_v62 = vpop.eup %3576  ;;  %v2509_v63 = vmul.f32 %v3575_v33, %v2477_v15  ;;  %v2527_v45 = vadd.f32 %v3088_v60, %v2517_v61  ;;  %v2658_v15 = vpack.c.bf16 %v3112_v14, %v3111_v13 }
0x14dc   : > { %v2508_v50 = vmul.f32 %v3577_v62, %v2476_v26  ;;  %v2656_v26 = vpack.c.bf16 %v3108_v24, %v3107_v1 }
0x14dd   : > { %v2535_v40 = vpack.c.bf16 %v2527_v45, %v2526_v39  ;;  %v2519_v0 = vmul.f32 %v3087_v56, %v2509_v63  ;;  %3389 = vmatprep.subr.bf16.mxu0 %v2658_v15 }
0x14de   : > { %v2518_v2 = vmul.f32 %v3087_v56, %v2508_v50  ;;  %3390 = vmatpush3.bf16.msra.mxu0 %v2658_v15 }
0x14df   : > { %3381 = vmatprep.mubr.msk.bf16.mxu1 %vm627_vm0, %v2535_v40  ;;  %v2529_v23 = vadd.f32 %v3088_v60, %v2519_v0  ;;  %3391 = vmatprep.subr.bf16.mxu0 %v2657_v19 }
0x14e0   : > { %v2528_v47 = vadd.f32 %v3088_v60, %v2518_v2 }
0x14e2   : > { %v2536_v58 = vpack.c.bf16 %v2529_v23, %v2528_v47  ;;  %3392 = vmatpush3.bf16.msra.mxu0 %v2657_v19 }
0x14e3   : > { %3393 = vmatprep.subr.bf16.mxu0 %v2656_v26 }
0x14e4   : > { %3382 = vmatmul.mubr.msk.bf16.vlgmr.msra.gmra.mxu1 %vm627_vm0, %v2536_v58 }
0x14e5   : > { %3409 = vmatprep.mubr.msk.bf16.mxu1 %vm3665_vm1, %v3664_v12 }
0x14e6   : > { %3394 = vmatpush3.bf16.msra.mxu0 %v2656_v26 }
0x14e7   : > { %3395 = vmatprep.subr.bf16.mxu0 %v2655_v28 }
0x14ea   : > { %3396 = vmatpush3.bf16.msra.mxu0 %v2655_v28 }
0x14eb   : > { %3397 = vmatprep.subr.bf16.mxu0 %v2654_v5 }
0x14ee   : > { %3398 = vmatpush3.bf16.msra.mxu0 %v2654_v5 }
0x14ef   : > { %3399 = vmatprep.subr.bf16.mxu0 %v2653_v36 }
0x14f2   : > { %3400 = vmatpush3.bf16.msra.mxu0 %v2653_v36 }
0x15a4   : > { %v3383_v38 = vpop.f32.mrf.mxu1 }
0x15a5   : > { %v2596_v42 = vadd.f32 %v3383_v38, %v3094_v37 }
0x15a6   : > { %v2587_v18 = vpop.f32.mrf.mxu1 }
0x15a7   : > { %v3099_v20 = vmul.f32 -1.702, %v2596_v42  ;;  %v2588_v22 = vadd.f32 %v3094_v37, %v2587_v18 }
0x15a8   : > { %v3384_v44 = vpop.f32.mrf.mxu1 }
0x15a9   : > { %v2614_v48 = vmul.f32 1.442695, %v3099_v20  ;;  %v3097_v7 = vmul.f32 -1.702, %v2588_v22  ;;  %v2599_v41 = vadd.f32 %v3384_v44, %v3094_v37 }
0x15aa   : > { %v2590_v6 = vpop.f32.mrf.mxu1 }
0x15ab   : > { %v2610_v49 = vmul.f32 1.442695, %v3097_v7  ;;  %v3100_v21 = vmul.f32 -1.702, %v2599_v41  ;;  %v2591_v52 = vadd.f32 %v3094_v37, %v2590_v6  ;;  %3578 = vpow2.f32 %v2614_v48 }
0x15ad   : > { %3580 = vpow2.f32 %v2610_v49  ;;  %v2616_v54 = vmul.f32 1.442695, %v3100_v21  ;;  %v3098_v55 = vmul.f32 -1.702, %v2591_v52 }
0x15af   : > { %3582 = vpow2.f32 %v2616_v54  ;;  %v2612_v56 = vmul.f32 1.442695, %v3098_v55  ;;  %v2796_v54 = vld [vmem:[%s602_s21] sm:$0xff]  ;;  %v2844_v55 = vld [vmem:[%s4502_s17 + $0x10] sm:$0xff] }
0x15b1   : > { %3584 = vpow2.f32 %v2612_v56  ;;  %v2845_v56 = vld [vmem:[%s4502_s17 + $0x18] sm:$0xff] }
0x15b8   : > { %v3579_v25 = vpop.eup %3578 }
0x15b9   : > { %v2620_v61 = vadd.f32 1.0, %v3579_v25  ;;  %v2849_v25 = vpack.c.bf16 %v2845_v56, %v2844_v55 }
0x15ba   : > { %v3581_v59 = vpop.eup %3580 }
0x15bb   : > { %v2618_v34 = vadd.f32 1.0, %v3581_v59  ;;  %3406 = vmatpush3.bf16.msra.mxu1 %v2849_v25  ;;  %v2842_v59 = vld [vmem:[%s4502_s17] sm:$0xff] }
0x15bc   : > { %v3583_v60 = vpop.eup %3582  ;;  %3407 = vmatprep.subr.bf16.mxu1 %v3664_v12 }
0x15bd   : > { %v2621_v33 = vadd.f32 1.0, %v3583_v60  ;;  %3586 = vrcp.f32 %v2618_v34  ;;  %v2843_v34 = vld [vmem:[%s4502_s17 + $0x8] sm:$0xff] }
0x15be   : > { %v3585_v62 = vpop.eup %3584  ;;  %v2848_v60 = vpack.c.bf16 %v2843_v34, %v2842_v59 }
0x15bf   : > { %3588 = vrcp.f32 %v2621_v33  ;;  %v2619_v63 = vadd.f32 1.0, %v3585_v62 }
0x15c0   : > { %3590 = vrcp.f32 %v2620_v61  ;;  %3408 = vmatpush3.bf16.msra.mxu1 %v2848_v60  ;;  %v3673_v60 = vmov 1966171168  }
0x15c1   : > { %3592 = vrcp.f32 %v2619_v63 }
0x15ca   : > { %v3587_v39 = vpop.eup %3586 }
0x15cb   : > { %v2630_v2 = vmul.f32 %v3587_v39, %v2588_v22 }
0x15cc   : > { %v3589_v45 = vpop.eup %3588 }
0x15cd   : > { %v3591_v50 = vpop.eup %3590  ;;  %v2633_v0 = vmul.f32 %v3589_v45, %v2599_v41 }
0x15ce   : > { %v3593_v40 = vpop.eup %3592  ;;  %v2632_v47 = vmul.f32 %v3591_v50, %v2596_v42 }
0x15cf   : > { %v2631_v23 = vmul.f32 %v3593_v40, %v2591_v52  ;;  %v2799_v52 = vld [vmem:[%s602_s21 + $0x18] sm:$0xff] }
0x15d0   : > { %v2652_v4 = vpack.c.bf16 %v2633_v0, %v2632_v47 }
0x15d1   : > { %v2651_v58 = vpack.c.bf16 %v2631_v23, %v2630_v2 }
0x15d3   : > { %3401 = vmatprep.mubr.bf16.mxu0 %v2651_v58 }
0x15d4   : > { %3402 = vmatmul.mubr.bf16.vlgmr.msra.gmra.mxu0 %v2652_v4 }
0x1694   : > { %v3403_v57 = vpop.f32.mrf.mxu0 }
0x1695   : > { %v2712_v53 = vadd.f32 %v3403_v57, %v3118_v10 }
0x1696   : > { %v2703_v11 = vpop.f32.mrf.mxu0 }
0x1697   : > { %v2704_v13 = vadd.f32 %v3118_v10, %v2703_v11  ;;  %v2720_v24 = vadd.f32 %v2712_v53, %v4301_v46  ;;  %v2797_v46 = vld [vmem:[%s602_s21 + $0x8] sm:$0xff]  ;;  %s4441_s21 = scalar_lea.hbm %s4503_s18, %s3129_s19  ;;  %s3608_s19 = scalar_lea.vmem %s3607_s1, 64 }
0x1698   : > { %v3404_v14 = vpop.f32.mrf.mxu0  ;;  %p3610_p1 = scmp.lt.s32.totalorder %s3608_s19, %s3602_s24 }
0x1699   : > { %v2718_v15 = vadd.f32 %v2704_v13, %v4290_v30  ;;  %v2715_v17 = vadd.f32 %v3404_v14, %v3118_v10  ;;  %v2730_v27 = vsel %vm627_vm0, %v2720_v24, 0.0 }
0x169a   : > { %v2706_v16 = vpop.f32.mrf.mxu0  ;;  %p3611_p2 = por %p3610_p1, %p3609_p0 }
0x169b   : > { %v2707_v19 = vadd.f32 %v3118_v10, %v2706_v16  ;;  %v2724_v1 = vsel %vm627_vm0, %v2718_v15, 0.0  ;;  %v2721_v28 = vadd.f32 %v2715_v17, %v4293_v51  ;;  %v3120_v10 = vld [vmem:[%s4501_s16] ss:$0 sm:$0xff] }
0x169c   : > { %2725 = vadd.xlane.f32.xlu0 %v2724_v1  ;;  %p3612_p3 = pnand %p3611_p2, %p3605_p13 }
0x169d   : > { %v2719_v26 = vadd.f32 %v2707_v19, %v4298_v43  ;;  %v2733_v30 = vsel %vm627_vm0, %v2721_v28, 0.0 }
0x169f   : > { %v2727_v3 = vsel %vm627_vm0, %v2719_v26, 0.0 }
0x16a0   : > { %2728 = vadd.xlane.f32.xlu1 %v2727_v3  ;;  %2731 = vadd.xlane.f32.xlu0 %v2730_v27 }
0x16a4   : > { %2734 = vadd.xlane.f32.xlu1 %v2733_v30 }
0x16b5   : > { %2807 = vperm.xlu1 %3465, %v2797_v46  }
0x16b9   : > { %2812 = vperm.xlu1 %3465, %v2798_v31  }
0x1725   : > { %v2726_v43 = vpop.xlane.xlu0 %2725 }
0x1726   : > { %v2736_v32 = vmul.f32 0.03125, %v2726_v43 }
0x1728   : > { %v2740_v51 = vsub.f32 %v2718_v15, %v2736_v32 }
0x1729   : > { %v2729_v5 = vpop.xlane.xlu1 %2728  ;;  %v2732_v35 = vpop.xlane.xlu0 %2731 }
0x172a   : > { %v2738_v9 = vmul.f32 0.03125, %v2732_v35  ;;  %v2737_v36 = vmul.f32 0.03125, %v2729_v5  ;;  %v2744_v48 = vmul.f32 %v2740_v51, %v2740_v51 }
0x172c   : > { %v2742_v37 = vsub.f32 %v2720_v24, %v2738_v9  ;;  %v2741_v20 = vsub.f32 %v2719_v26, %v2737_v36  ;;  %v2748_v6 = vsel %vm627_vm0, %v2744_v48, 0.0 }
0x172d   : > { %v2735_v38 = vpop.xlane.xlu1 %2734 }
0x172e   : > { %v2739_v42 = vmul.f32 0.03125, %v2735_v38  ;;  %v2746_v18 = vmul.f32 %v2742_v37, %v2742_v37  ;;  %v2745_v49 = vmul.f32 %v2741_v20, %v2741_v20 }
0x1730   : > { %v2743_v22 = vsub.f32 %v2721_v28, %v2739_v42  ;;  %v2754_v44 = vsel %vm627_vm0, %v2746_v18, 0.0  ;;  %v2751_v21 = vsel %vm627_vm0, %v2745_v49, 0.0 }
0x1731   : > { %2755 = vadd.xlane.f32.xlu0 %v2754_v44  ;;  %v2808_v61 = vpop.permute.xlu1 %2807 }
0x1732   : > { %v2747_v7 = vmul.f32 %v2743_v22, %v2743_v22 }
0x1734   : > { %v2757_v41 = vsel %vm627_vm0, %v2747_v7, 0.0 }
0x1735   : > { %2758 = vadd.xlane.f32.xlu1 %v2757_v41  ;;  %2749 = vadd.xlane.f32.xlu0 %v2748_v6  ;;  %v2813_v33 = vpop.permute.xlu1 %2812 }
0x1739   : > { %2752 = vadd.xlane.f32.xlu1 %v2751_v21 }
0x174a   : > { %2817 = vperm.xlu1 %3465, %v2799_v52  }
0x174b   : > { %2802 = vperm.xlu0 %3464, %v2796_v54  }
0x17ba   : > { %v2756_v62 = vpop.xlane.xlu0 %2755 }
0x17bb   : > { %v2762_v63 = vmul.f32 0.03125, %v2756_v62 }
0x17bd   : > { %v2766_v39 = vadd.f32 1e-05, %v2762_v63 }
0x17be   : > { %v2759_v45 = vpop.xlane.xlu1 %2758  ;;  %v2750_v50 = vpop.xlane.xlu0 %2749 }
0x17bf   : > { %3594 = vrsqrt.f32 %v2766_v39  ;;  %v2763_v40 = vmul.f32 0.03125, %v2759_v45  ;;  %v2760_v12 = vmul.f32 0.03125, %v2750_v50 }
0x17c1   : > { %v2767_v0 = vadd.f32 1e-05, %v2763_v40  ;;  %v2764_v2 = vadd.f32 1e-05, %v2760_v12 }
0x17c2   : > { %v2753_v23 = vpop.xlane.xlu1 %2752 }
0x17c3   : > { %3596 = vrsqrt.f32 %v2767_v0  ;;  %v2761_v47 = vmul.f32 0.03125, %v2753_v23 }
0x17c4   : > { %3598 = vrsqrt.f32 %v2764_v2 }
0x17c5   : > { %v2765_v58 = vadd.f32 1e-05, %v2761_v47 }
0x17c6   : > { %v2818_v27 = vpop.permute.xlu1 %2817  ;;  %v2803_v30 = vpop.permute.xlu0 %2802 }
0x17c7   : > { %3600 = vrsqrt.f32 %v2765_v58 }
0x17cc   : > { %v3595_v4 = vpop.eup %3594 }
0x17cd   : > { %v2774_v57 = vmul.f32 %v3595_v4, %v2742_v37 }
0x17cf   : > { %v2784_v11 = vmul.f32 %v3119_v8, %v2774_v57 }
0x17d0   : > { %v3597_v53 = vpop.eup %3596 }
0x17d1   : > { %v3599_v13 = vpop.eup %3598  ;;  %v2775_v14 = vmul.f32 %v3597_v53, %v2743_v22  ;;  %v2794_v15 = vadd.f32 %v3120_v10, %v2784_v11 }
0x17d2   : > { %v2772_v16 = vmul.f32 %v3599_v13, %v2740_v51 }
0x17d3   : > { %v2785_v17 = vmul.f32 %v3119_v8, %v2775_v14  ;;  %v2822_v26 = vmul.f32 %v2813_v33, %v2794_v15 }
0x17d4   : > { %v3601_v19 = vpop.eup %3600  ;;  %v2782_v1 = vmul.f32 %v3119_v8, %v2772_v16 }
0x17d5   : > { %v2795_v24 = vadd.f32 %v3120_v10, %v2785_v17  ;;  %v2773_v3 = vmul.f32 %v3601_v19, %v2741_v20  ;;  %v2833_v43 = vsel %vm627_vm0, %v2822_v26, 0.0 }
0x17d6   : > { %v2792_v28 = vadd.f32 %v3120_v10, %v2782_v1 }
0x17d7   : > { %v2823_v46 = vmul.f32 %v2818_v27, %v2795_v24  ;;  %v2783_v31 = vmul.f32 %v3119_v8, %v2773_v3 }
0x17d8   : > { %v2820_v35 = vmul.f32 %v2803_v30, %v2792_v28 }
0x17d9   : > { %v2834_v32 = vsel %vm627_vm0, %v2823_v46, 0.0  ;;  %v2793_v5 = vadd.f32 %v3120_v10, %v2783_v31 }
0x17da   : > { %v2835_v9 = vadd.f32 %v2834_v32, %v2833_v43  ;;  %v2824_v38 = vsel %vm627_vm0, %v2820_v35, 0.0 }
0x17db   : > { %v2821_v36 = vmul.f32 %v2808_v61, %v2793_v5  ;;  %v2902_v61 = vunpack.c.l.s4 %v3673_v60 }
0x17dc   : > { %v2836_v51 = vrot.slane %v2835_v9, 4 }
0x17dd   : > { %v2825_v37 = vsel %vm627_vm0, %v2821_v36, 0.0  ;;  %v2903_v33 = vunpack.c.0.s8 %v2902_v61 }
0x17de   : > { %v2837_v42 = vadd.f32 %v2836_v51, %v2835_v9  ;;  %v2826_v18 = vadd.f32 %v2825_v37, %v2824_v38 }
0x17df   : > { %v2906_v62 = vsub.s32 %v2903_v33, %v3908_v29 }
0x17e0   : > { %v2838_v20 = vrot.slane %v2837_v42, 2  ;;  %v2827_v22 = vrot.slane %v2826_v18, 4 }
0x17e2   : > { %v2839_v44 = vadd.f32 %v2838_v20, %v2837_v42  ;;  %v2828_v48 = vadd.f32 %v2827_v22, %v2826_v18 }
0x17e4   : > { %v2840_v7 = vrot.slane %v2839_v44, 1  ;;  %v2829_v41 = vrot.slane %v2828_v48, 2 }
0x17e6   : > { %v2841_v6 = vadd.f32 %v2840_v7, %v2839_v44  ;;  %v2830_v49 = vadd.f32 %v2829_v41, %v2828_v48 }
0x17e8   : > { %v2831_v21 = vrot.slane %v2830_v49, 1  ;;  %v2847_v52 = vpack.c.bf16 %v2841_v6, %v2841_v6 }
0x17ea   : > { %v2832_v54 = vadd.f32 %v2831_v21, %v2830_v49  ;;  %v2853_v56 = vunpack.c.l.b16 %v2847_v52 }
0x17ec   : > { %v2846_v55 = vpack.c.bf16 %v2832_v54, %v2832_v54 }
0x17ee   : > { %v2852_v25 = vunpack.c.l.b16 %v2846_v55 }
0x17f0   : > { %v2855_v59 = vsel %vm2854_vm5, %v2853_v56, %v2852_v25 }
0x17f1   : > { %v2856_v34 = vpack.c.b16 %v2855_v59, %v2855_v59 }
0x17f3   : > { %3410 = vmatmul.mubr.msk.bf16.vlgmr.msra.gmra.mxu1 %vm627_vm0, %v2856_v34 }
0x18b3   : > { %v2894_v63 = vpop.f32.mrf.mxu1 }
0x18b4   : > { %v2907_v39 = vrot.slane %v2894_v63, %v2906_v62 }
0x18b5   : > { %v3411_v45 = vpop.f32.mrf.mxu1 }
0x18b6   : > { %v2908_v50 = vcombine.high %v2907_v39, %v2907_v39  ;;  %v2915_v40 = vrot.slane %v2907_v39, %v2906_v62 }
0x18b7   : > { %v2897_v12 = vpop.f32.mrf.mxu1 }
0x18b8   : > { %v2922_v29 = vrot.slane %v2908_v50, %v2906_v62  ;;  %2926 = vst.msk [vmem:[%s589_s23] sm:$0x1] %vm2925_vm6, %v2915_v40 }
0x18b9   : > { %v3412_v0 = vpop.f32.mrf.mxu1 }
0x18ba   : > { %2927 = vst.msk [vmem:[%s589_s23 + $0x1] sm:$0x1] %vm2925_vm6, %v2922_v29 }
0x18bb   : > { %3615 = shalt.err (!%p3612_p3)
}
0x18bc   : > { %s3616_s29 = scalar_lea.hbm %s4441_s21, 32  ;;  %s3620_s22 = scalar_lea.hbm %s4503_s18, 64 }
0x18bd   : > { %p3617_p4 = scmp.ne.s32.totalorder %s4441_s21, %s3616_s29  ;;  %p3621_p9 = scmp.lt.s32.totalorder %s4441_s21, %s4503_s18 }
0x18be   : > { %p3622_p10 = scmp.lt.s32.totalorder %s3620_s22, %s3616_s29 }
0x18bf   : > { %p3618_p7 = pnand %p3617_p4, %p3810_p5 }
0x18c0   : > { %p3623_p11 = por %p3622_p10, %p3621_p9 }
0x18c1   : > { %p3619_p8 = pneg %p3618_p7 }
0x18c3   : > { %p3624_p12 = pnand %p3623_p11, %p3619_p8 }
0x18c5   : > { %3627 = shalt.err (!%p3624_p12)
}
0x18c6   : > { %s3675_s24 = smov 16   ;;  %s3676_s1 = smov 1  }
0x18c7   : > { %3413 = dma.vmem_to_hbm [thread:$0]  (%p3810_p5), %s4443_s26, 32, %s4441_s21, %s4445_s0, %s3675_s24, %s3675_s24, %s3676_s1  }
0x18c8 PF: > { %s4539_s19 = sld [smem:[#allocation5_spill]]  ;;  %p3419_p13 = scmp.ge.s32.totalorder %s3662_s30, 2 }
0x18ca   : > { %p3416_p0 = pnand %p3419_p13, %p3814_p6 }
0x18cc   : > { %p3417_p1 = pneg %p3416_p0 }
0x18ce   : > { %s2957_s25 = sand.u32 1, %s4539_s19  }
0x18cf   : > { %s2958_s3 = scalar_lea.sflag [#allocation3], %s2957_s25 }
0x18d0   : > { %3645 = dma.done.wait (%p3417_p1), %s2958_s3, 32  }
0x18d1   : > { %3647 = vsyncadd (%p3417_p1), %s2958_s3, 4294967264  ;;  %s4541_s30 = sld [smem:[#allocation7_spill]]  ;;  %s4544_s27 = smov %s3654_s28 }
0x18d2   : > { %s4542_s29 = sld [smem:[#allocation6_spill]] }
0x18d3   : > { %s4543_s22 = sld [smem:[#allocation8_spill]] }
0x18d7   : > { %p28_p2 = scmp.ge.s32.totalorder %s4541_s30, 4  }
0x18d8   : > { %s4545_s28 = smov %s4542_s29 }
0x18d9   : > { %s4546_s29 = smov %s4543_s22  ;;  %30 = sbr.rel (!%p28_p2) target bundleno = 8 (0x8), region = 142 }
0x18de   :  { %2963 = vsyncpa [#allocation3], 1 }
0x18df   :  { %2965 = vsyncpa [#allocation3 + $0x1], 1 }

</bundles_post_ra>
